<compile_context>
chip_gen: v7x
topology: tpu7x:2x2x1
jax: 0.10.0
libtpu: 0.0.40
codegen_flags: <defaults>
</compile_context>

<pallas_src>
import functools

import jax
import jax.numpy as jnp
from jax import lax
from jax.experimental import pallas as pl
from jax.experimental.pallas import tpu as pltpu


# ----------------------------------------------------------------------------------
# Kernel
# ----------------------------------------------------------------------------------
def encdec_kernel(x_ref, wih_ref, whh_ref, b_ref,
                  w1_ref, b1_ref, w2_ref, b2_ref,
                  out_ref,
                  gx_ref, hs_ref,
                  *, seq_ab, seq_cuts, hidden):
    H = hidden
    max_seq = hs_ref.shape[0]

    # 1) Hoisted input projection + bias for BOTH encoders, all timesteps: ONE matmul
    #    (removes one MXU push, one dynamic load and the bias add from every serial step).
    gx_ref[...] = (jnp.dot(x_ref[...], wih_ref[...],
                           preferred_element_type=jnp.float32)
                   + b_ref[...])                                   # (max_seq, 8H)

    whh = whh_ref[...]                                             # (2H, 8H) bf16

    # 2) Fused recurrence: both encoders advance each step through a single
    #    block-diagonal (2H, 8H) matmul in the gate-interleaved layout
    #    [i_ab,i_cu,f_ab,f_cu,g_ab,g_cu,o_ab,o_cu].  State layout is [ab | cu].
    h = jnp.zeros((1, 2 * H), jnp.float32)
    c = jnp.zeros((1, 2 * H), jnp.float32)
    for t in range(max_seq):   # static trip count -> fully unrolled, static offsets
        gates = (jnp.dot(h.astype(jnp.bfloat16), whh,              # bf16 MXU, f32 acc
                         preferred_element_type=jnp.float32)
                 + gx_ref[pl.ds(t, 1), :])                         # (1, 8H) f32
        sig = jax.nn.sigmoid(gates)    # one EUP pass over the full 8H lanes
        tnh = jnp.tanh(gates)          # one EUP pass over the full 8H lanes
        i_g = sig[:, 0 * H:2 * H]      # [i_ab | i_cu]
        f_g = sig[:, 2 * H:4 * H]      # [f_ab | f_cu]
        g_g = tnh[:, 4 * H:6 * H]      # [g_ab | g_cu]
        o_g = sig[:, 6 * H:8 * H]      # [o_ab | o_cu]
        c = f_g * c + i_g * g_g
        h = o_g * jnp.tanh(c)
        hs_ref[pl.ds(t, 1), :] = h     # row t = [h_ab(t) | h_cu(t)]

    # 3) Shared MLP per timestep (off the serial path; keep f32 for accuracy).
    hs = hs_ref[...]
    hs_ab = hs[:seq_ab, :H]            # all Ab timesteps
    hs_cu = hs[:seq_cuts, H:2 * H]     # all cuts timesteps (padded rows never read)

    def mlp(x):
        h1 = jnp.dot(x, w1_ref[...], preferred_element_type=jnp.float32) + b1_ref[...]
        h1 = jnp.maximum(h1, 0.0)
        return jnp.dot(h1, w2_ref[...], preferred_element_type=jnp.float32) + b2_ref[...]

    gj = mlp(hs_ab)                    # (seq_ab,  L)
    hi = mlp(hs_cu)                    # (seq_cuts, L)

    # 4) mean(hi @ gj.T, axis=1) == mean(gj, axis=0) @ hi.T   (exact algebraic fold)
    #    -> no (S_cuts, S_ab) scores tile, lane-dense (1, seq_cuts) output.
    gj_mean = jnp.mean(gj, axis=0, keepdims=True)                  # (1, L)
    out_ref[...] = lax.dot_general(
        gj_mean, hi, dimension_numbers=(((1,), (1,)), ((), ())),
        preferred_element_type=jnp.float32)                        # (1, seq_cuts)


# ----------------------------------------------------------------------------------
# Wrapper (host-side layout plumbing: fused gate-interleaved weights)
# ----------------------------------------------------------------------------------
def encdecoder_actor_forward(Ab, cuts, params):
    """Ab: (S_ab, input_size), cuts: (S_cuts, input_size) float32.  Returns (S_cuts,)."""
    seq_ab, in_size = Ab.shape
    seq_cuts, _ = cuts.shape
    H = params["w1"].shape[1]          # Linear weight (L, H) -> H
    max_seq = max(seq_ab, seq_cuts)
    f32 = jnp.float32

    # Transposed per-gate blocks in PyTorch gate order (i, f, g, o).
    def gate_blocks(w):                # (4H, K) -> 4 blocks of (K, H)
        return [w[k * H:(k + 1) * H, :].T.astype(f32) for k in range(4)]

    ab_ih, cu_ih = gate_blocks(params["ab_w_ih"]), gate_blocks(params["cu_w_ih"])
    ab_hh, cu_hh = gate_blocks(params["ab_w_hh"]), gate_blocks(params["cu_w_hh"])
    b_ab = (params["ab_b_ih"] + params["ab_b_hh"]).astype(f32)
    b_cu = (params["cu_b_ih"] + params["cu_b_hh"]).astype(f32)

    # Block-diagonal, gate-interleaved fused weights:
    #   columns = [i_ab,i_cu, f_ab,f_cu, g_ab,g_cu, o_ab,o_cu], each H wide.
    wih_cols, whh_cols, b_parts = [], [], []
    for k in range(4):
        wih_cols += [jnp.concatenate([ab_ih[k], jnp.zeros_like(cu_ih[k])], axis=0),
                     jnp.concatenate([jnp.zeros_like(ab_ih[k]), cu_ih[k]], axis=0)]
        whh_cols += [jnp.concatenate([ab_hh[k], jnp.zeros_like(cu_hh[k])], axis=0),
                     jnp.concatenate([jnp.zeros_like(ab_hh[k]), cu_hh[k]], axis=0)]
        b_parts += [b_ab[k * H:(k + 1) * H], b_cu[k * H:(k + 1) * H]]

    w_ih_comb = jnp.concatenate(wih_cols, axis=1)                       # (2*in, 8H) f32
    w_hh_comb = jnp.concatenate(whh_cols, axis=1).astype(jnp.bfloat16)  # (2H, 8H) bf16
    b_comb = jnp.concatenate(b_parts).reshape(1, -1)                    # (1, 8H) f32

    # Combined input: row t = [Ab[t] (zero-padded) | cuts[t] (zero-padded)].
    x_comb = jnp.zeros((max_seq, 2 * in_size), f32)
    x_comb = x_comb.at[:seq_ab, :in_size].set(Ab.astype(f32))
    x_comb = x_comb.at[:seq_cuts, in_size:].set(cuts.astype(f32))

    inputs = (x_comb, w_ih_comb, w_hh_comb, b_comb,
              params["w1"].T.astype(f32), params["b1"].reshape(1, -1).astype(f32),
              params["w2"].T.astype(f32), params["b2"].reshape(1, -1).astype(f32))

    vmem = pl.BlockSpec(memory_space=pltpu.MemorySpace.VMEM)
    kernel = functools.partial(encdec_kernel, seq_ab=seq_ab, seq_cuts=seq_cuts, hidden=H)

    out = pl.pallas_call(
        kernel,
        out_shape=jax.ShapeDtypeStruct((1, seq_cuts), jnp.float32),     # lane-dense row
        in_specs=[vmem] * len(inputs),
        out_specs=vmem,
        scratch_shapes=[
            pltpu.VMEM((max_seq, 8 * H), jnp.float32),   # hoisted gates_x (both encoders)
            pltpu.VMEM((max_seq, 2 * H), jnp.float32),   # per-step hidden [h_ab | h_cu]
        ],
    )(*inputs)
    return out[0]


# ----------------------------------------------------------------------------------
# Deterministic parameter init (PyTorch-style uniform ranges, synthetic values)
# ----------------------------------------------------------------------------------
def init_params(key, input_size, hidden_size, linear_size):
    ks = jax.random.split(key, 12)
    k_lstm = 1.0 / jnp.sqrt(hidden_size)
    k_l1 = 1.0 / jnp.sqrt(hidden_size)
    k_l2 = 1.0 / jnp.sqrt(linear_size)
    u = lambda k, shape, bound: jax.random.uniform(k, shape, jnp.float32, -bound, bound)
    return {
        # AbRNN LSTM (gate order i, f, g, o — PyTorch convention)
        "ab_w_ih": u(ks[0], (4 * hidden_size, input_size), k_lstm),
        "ab_w_hh": u(ks[1], (4 * hidden_size, hidden_size), k_lstm),
        "ab_b_ih": u(ks[2], (4 * hidden_size,), k_lstm),
        "ab_b_hh": u(ks[3], (4 * hidden_size,), k_lstm),
        # cutsRNN LSTM
        "cu_w_ih": u(ks[4], (4 * hidden_size, input_size), k_lstm),
        "cu_w_hh": u(ks[5], (4 * hidden_size, hidden_size), k_lstm),
        "cu_b_ih": u(ks[6], (4 * hidden_size,), k_lstm),
        "cu_b_hh": u(ks[7], (4 * hidden_size,), k_lstm),
        # shared MLP: Linear(H -> L), ReLU, Linear(L -> L)
        "w1": u(ks[8], (linear_size, hidden_size), k_l1),
        "b1": u(ks[9], (linear_size,), k_l1),
        "w2": u(ks[10], (linear_size, linear_size), k_l2),
        "b2": u(ks[11], (linear_size,), k_l2),
    }


# ----------------------------------------------------------------------------------
# Pure-JAX reference (mirrors the PyTorch forward) for a correctness check
# ----------------------------------------------------------------------------------
def _lstm_ref(x, w_ih, w_hh, b_ih, b_hh, hidden):
    def step(carry, x_t):
        h, c = carry
        gates = x_t @ w_ih.T + b_ih + h @ w_hh.T + b_hh
        i, f, g, o = jnp.split(gates, 4)
        i, f, o = jax.nn.sigmoid(i), jax.nn.sigmoid(f), jax.nn.sigmoid(o)
        g = jnp.tanh(g)
        c = f * c + i * g
        h = o * jnp.tanh(c)
        return (h, c), h
    _, hs = lax.scan(step, (jnp.zeros(hidden), jnp.zeros(hidden)), x)
    return hs


def reference_forward(Ab, cuts, p):
    hidden = p["w1"].shape[1]

    def mlp(x):
        h1 = jnp.maximum(x @ p["w1"].T + p["b1"], 0.0)
        return h1 @ p["w2"].T + p["b2"]

    gj = mlp(_lstm_ref(Ab, p["ab_w_ih"], p["ab_w_hh"], p["ab_b_ih"], p["ab_b_hh"], hidden))
    hi = mlp(_lstm_ref(cuts, p["cu_w_ih"], p["cu_w_hh"], p["cu_b_ih"], p["cu_b_hh"], hidden))
    return jnp.mean(hi @ gj.T, axis=1)


# ----------------------------------------------------------------------------------
if __name__ == "__main__":
    input_size, hidden_size, linear_size = 4, 32, 32
    seq_ab, seq_cuts = 16, 8

    key = jax.random.PRNGKey(0)
    k_ab, k_cuts, k_params = jax.random.split(key, 3)
    Ab = jax.random.normal(k_ab, (seq_ab, input_size), jnp.float32)
    cuts = jax.random.normal(k_cuts, (seq_cuts, input_size), jnp.float32)
    params = init_params(k_params, input_size, hidden_size, linear_size)

    out = encdecoder_actor_forward(Ab, cuts, params)
    out = jax.block_until_ready(out)

    ref = jax.block_until_ready(reference_forward(Ab, cuts, params))
    assert out.shape == (seq_cuts,)
    # Tolerance: recurrent matmul operands are bf16 (f32 accumulation) + MXU f32
    # rounding differs slightly from the pure-XLA f32 reference.
    assert jnp.allclose(out, ref, rtol=2e-2, atol=2e-2), (out, ref)

    print("KERNEL_OK")
</pallas_src>

<mosaic_0001>
module attributes {stable_mosaic.version = 11 : i64} {
  func.func @encdec_kernel(%arg0: memref<16x8xf32, #tpu.memory_space<vmem>>, %arg1: memref<8x256xf32, #tpu.memory_space<vmem>>, %arg2: memref<64x256xbf16, #tpu.memory_space<vmem>>, %arg3: memref<1x256xf32, #tpu.memory_space<vmem>>, %arg4: memref<32x32xf32, #tpu.memory_space<vmem>>, %arg5: memref<1x32xf32, #tpu.memory_space<vmem>>, %arg6: memref<32x32xf32, #tpu.memory_space<vmem>>, %arg7: memref<1x32xf32, #tpu.memory_space<vmem>>, %arg8: memref<1x8xf32, #tpu.memory_space<vmem>>, %arg9: memref<16x256xf32, #tpu.memory_space<vmem>>, %arg10: memref<16x64xf32, #tpu.memory_space<vmem>>) attributes {dimension_semantics = [], scalar_prefetch = 0 : i64, scratch_operands = 2 : i64, tpu.core_type = #tpu.core_type<tc>} {
    %c0 = arith.constant 0 : index
    %c0_0 = arith.constant 0 : index
    %0 = vector.load %arg0[%c0, %c0_0] : memref<16x8xf32, #tpu.memory_space<vmem>>, vector<16x8xf32>
    %c0_1 = arith.constant 0 : index
    %c0_2 = arith.constant 0 : index
    %1 = vector.load %arg1[%c0_1, %c0_2] : memref<8x256xf32, #tpu.memory_space<vmem>>, vector<8x256xf32>
    %cst = arith.constant dense<0.000000e+00> : vector<16x256xf32>
    %2 = tpu.matmul %0, %1, %cst {dimension_numbers = #tpu.dot_dimension_numbers<[1], [0], [0], [1], [0, 0, 1, 1], [], []>} : vector<16x8xf32>, vector<8x256xf32>, vector<16x256xf32> -> vector<16x256xf32>
    %c0_3 = arith.constant 0 : index
    %c0_4 = arith.constant 0 : index
    %3 = vector.load %arg3[%c0_3, %c0_4] : memref<1x256xf32, #tpu.memory_space<vmem>>, vector<1x256xf32>
    %4 = vector.broadcast %3 : vector<1x256xf32> to vector<16x256xf32>
    %5 = arith.addf %2, %4 : vector<16x256xf32>
    %c0_5 = arith.constant 0 : index
    %c0_6 = arith.constant 0 : index
    %6 = vector.load %arg9[%c0_5, %c0_6] : memref<16x256xf32, #tpu.memory_space<vmem>>, vector<16x256xf32>
    tpu.vector_store %arg9[%c0_5, %c0_6], %5 {strides = array<i32>} : memref<16x256xf32, #tpu.memory_space<vmem>>, vector<16x256xf32>,
    %c0_7 = arith.constant 0 : index
    %c0_8 = arith.constant 0 : index
    %7 = vector.load %arg2[%c0_7, %c0_8] : memref<64x256xbf16, #tpu.memory_space<vmem>>, vector<64x256xbf16>
    %cst_9 = arith.constant 0.000000e+00 : f32
    %8 = vector.broadcast %cst_9 : f32 to vector<1x64xf32>
    %cst_10 = arith.constant 0.000000e+00 : f32
    %9 = vector.broadcast %cst_10 : f32 to vector<1x64xf32>
    %10 = arith.truncf %8 : vector<1x64xf32> to vector<1x64xbf16>
    %cst_11 = arith.constant dense<0.000000e+00> : vector<1x256xf32>
    %11 = tpu.matmul %10, %7, %cst_11 {dimension_numbers = #tpu.dot_dimension_numbers<[1], [0], [0], [1], [0, 0, 1, 1], [], []>} : vector<1x64xbf16>, vector<64x256xbf16>, vector<1x256xf32> -> vector<1x256xf32>
    %c0_12 = arith.constant 0 : index
    %c0_13 = arith.constant 0 : index
    %12 = vector.load %arg9[%c0_12, %c0_13] : memref<16x256xf32, #tpu.memory_space<vmem>>, vector<1x256xf32>
    %13 = arith.addf %11, %12 : vector<1x256xf32>
    %14 = arith.negf %13 : vector<1x256xf32>
    %15 = math.exp %14 : vector<1x256xf32>
    %cst_14 = arith.constant 1.000000e+00 : f32
    %16 = vector.broadcast %cst_14 : f32 to vector<1x256xf32>
    %17 = arith.addf %16, %15 : vector<1x256xf32>
    %18 = arith.divf %16, %17 : vector<1x256xf32>
    %19 = math.tanh %13 : vector<1x256xf32>
    %20 = vector.extract_strided_slice %18 {offsets = [0, 0], sizes = [1, 64], strides = [1, 1]} : vector<1x256xf32> to vector<1x64xf32>
    %21 = vector.extract_strided_slice %18 {offsets = [0, 64], sizes = [1, 64], strides = [1, 1]} : vector<1x256xf32> to vector<1x64xf32>
    %22 = vector.extract_strided_slice %19 {offsets = [0, 128], sizes = [1, 64], strides = [1, 1]} : vector<1x256xf32> to vector<1x64xf32>
    %23 = vector.extract_strided_slice %18 {offsets = [0, 192], sizes = [1, 64], strides = [1, 1]} : vector<1x256xf32> to vector<1x64xf32>
    %24 = arith.mulf %21, %9 : vector<1x64xf32>
    %25 = arith.mulf %20, %22 : vector<1x64xf32>
    %26 = arith.addf %24, %25 : vector<1x64xf32>
    %27 = math.tanh %26 : vector<1x64xf32>
    %28 = arith.mulf %23, %27 : vector<1x64xf32>
    %c0_15 = arith.constant 0 : index
    %c0_16 = arith.constant 0 : index
    %29 = vector.load %arg10[%c0_15, %c0_16] : memref<16x64xf32, #tpu.memory_space<vmem>>, vector<1x64xf32>
    tpu.vector_store %arg10[%c0_15, %c0_16], %28 {strides = array<i32>} : memref<16x64xf32, #tpu.memory_space<vmem>>, vector<1x64xf32>,
    %30 = arith.truncf %28 : vector<1x64xf32> to vector<1x64xbf16>
    %cst_17 = arith.constant dense<0.000000e+00> : vector<1x256xf32>
    %31 = tpu.matmul %30, %7, %cst_17 {dimension_numbers = #tpu.dot_dimension_numbers<[1], [0], [0], [1], [0, 0, 1, 1], [], []>} : vector<1x64xbf16>, vector<64x256xbf16>, vector<1x256xf32> -> vector<1x256xf32>
    %c1 = arith.constant 1 : index
    %c0_18 = arith.constant 0 : index
    %32 = vector.load %arg9[%c1, %c0_18] : memref<16x256xf32, #tpu.memory_space<vmem>>, vector<1x256xf32>
    %33 = arith.addf %31, %32 : vector<1x256xf32>
    %34 = arith.negf %33 : vector<1x256xf32>
    %35 = math.exp %34 : vector<1x256xf32>
    %cst_19 = arith.constant 1.000000e+00 : f32
    %36 = vector.broadcast %cst_19 : f32 to vector<1x256xf32>
    %37 = arith.addf %36, %35 : vector<1x256xf32>
    %38 = arith.divf %36, %37 : vector<1x256xf32>
    %39 = math.tanh %33 : vector<1x256xf32>
    %40 = vector.extract_strided_slice %38 {offsets = [0, 0], sizes = [1, 64], strides = [1, 1]} : vector<1x256xf32> to vector<1x64xf32>
    %41 = vector.extract_strided_slice %38 {offsets = [0, 64], sizes = [1, 64], strides = [1, 1]} : vector<1x256xf32> to vector<1x64xf32>
    %42 = vector.extract_strided_slice %39 {offsets = [0, 128], sizes = [1, 64], strides = [1, 1]} : vector<1x256xf32> to vector<1x64xf32>
    %43 = vector.extract_strided_slice %38 {offsets = [0, 192], sizes = [1, 64], strides = [1, 1]} : vector<1x256xf32> to vector<1x64xf32>
    %44 = arith.mulf %41, %26 : vector<1x64xf32>
    %45 = arith.mulf %40, %42 : vector<1x64xf32>
    %46 = arith.addf %44, %45 : vector<1x64xf32>
    %47 = math.tanh %46 : vector<1x64xf32>
    %48 = arith.mulf %43, %47 : vector<1x64xf32>
    %c1_20 = arith.constant 1 : index
    %c0_21 = arith.constant 0 : index
    %49 = vector.load %arg10[%c1_20, %c0_21] : memref<16x64xf32, #tpu.memory_space<vmem>>, vector<1x64xf32>
    tpu.vector_store %arg10[%c1_20, %c0_21], %48 {strides = array<i32>} : memref<16x64xf32, #tpu.memory_space<vmem>>, vector<1x64xf32>,
    %50 = arith.truncf %48 : vector<1x64xf32> to vector<1x64xbf16>
    %cst_22 = arith.constant dense<0.000000e+00> : vector<1x256xf32>
    %51 = tpu.matmul %50, %7, %cst_22 {dimension_numbers = #tpu.dot_dimension_numbers<[1], [0], [0], [1], [0, 0, 1, 1], [], []>} : vector<1x64xbf16>, vector<64x256xbf16>, vector<1x256xf32> -> vector<1x256xf32>
    %c2 = arith.constant 2 : index
    %c0_23 = arith.constant 0 : index
    %52 = vector.load %arg9[%c2, %c0_23] : memref<16x256xf32, #tpu.memory_space<vmem>>, vector<1x256xf32>
    %53 = arith.addf %51, %52 : vector<1x256xf32>
    %54 = arith.negf %53 : vector<1x256xf32>
    %55 = math.exp %54 : vector<1x256xf32>
    %cst_24 = arith.constant 1.000000e+00 : f32
    %56 = vector.broadcast %cst_24 : f32 to vector<1x256xf32>
    %57 = arith.addf %56, %55 : vector<1x256xf32>
    %58 = arith.divf %56, %57 : vector<1x256xf32>
    %59 = math.tanh %53 : vector<1x256xf32>
    %60 = vector.extract_strided_slice %58 {offsets = [0, 0], sizes = [1, 64], strides = [1, 1]} : vector<1x256xf32> to vector<1x64xf32>
    %61 = vector.extract_strided_slice %58 {offsets = [0, 64], sizes = [1, 64], strides = [1, 1]} : vector<1x256xf32> to vector<1x64xf32>
    %62 = vector.extract_strided_slice %59 {offsets = [0, 128], sizes = [1, 64], strides = [1, 1]} : vector<1x256xf32> to vector<1x64xf32>
    %63 = vector.extract_strided_slice %58 {offsets = [0, 192], sizes = [1, 64], strides = [1, 1]} : vector<1x256xf32> to vector<1x64xf32>
    %64 = arith.mulf %61, %46 : vector<1x64xf32>
    %65 = arith.mulf %60, %62 : vector<1x64xf32>
    %66 = arith.addf %64, %65 : vector<1x64xf32>
    %67 = math.tanh %66 : vector<1x64xf32>
    %68 = arith.mulf %63, %67 : vector<1x64xf32>
    %c2_25 = arith.constant 2 : index
    %c0_26 = arith.constant 0 : index
    %69 = vector.load %arg10[%c2_25, %c0_26] : memref<16x64xf32, #tpu.memory_space<vmem>>, vector<1x64xf32>
    tpu.vector_store %arg10[%c2_25, %c0_26], %68 {strides = array<i32>} : memref<16x64xf32, #tpu.memory_space<vmem>>, vector<1x64xf32>,
    %70 = arith.truncf %68 : vector<1x64xf32> to vector<1x64xbf16>
    %cst_27 = arith.constant dense<0.000000e+00> : vector<1x256xf32>
    %71 = tpu.matmul %70, %7, %cst_27 {dimension_numbers = #tpu.dot_dimension_numbers<[1], [0], [0], [1], [0, 0, 1, 1], [], []>} : vector<1x64xbf16>, vector<64x256xbf16>, vector<1x256xf32> -> vector<1x256xf32>
    %c3 = arith.constant 3 : index
    %c0_28 = arith.constant 0 : index
    %72 = vector.load %arg9[%c3, %c0_28] : memref<16x256xf32, #tpu.memory_space<vmem>>, vector<1x256xf32>
    %73 = arith.addf %71, %72 : vector<1x256xf32>
    %74 = arith.negf %73 : vector<1x256xf32>
    %75 = math.exp %74 : vector<1x256xf32>
    %cst_29 = arith.constant 1.000000e+00 : f32
    %76 = vector.broadcast %cst_29 : f32 to vector<1x256xf32>
    %77 = arith.addf %76, %75 : vector<1x256xf32>
    %78 = arith.divf %76, %77 : vector<1x256xf32>
    %79 = math.tanh %73 : vector<1x256xf32>
    %80 = vector.extract_strided_slice %78 {offsets = [0, 0], sizes = [1, 64], strides = [1, 1]} : vector<1x256xf32> to vector<1x64xf32>
    %81 = vector.extract_strided_slice %78 {offsets = [0, 64], sizes = [1, 64], strides = [1, 1]} : vector<1x256xf32> to vector<1x64xf32>
    %82 = vector.extract_strided_slice %79 {offsets = [0, 128], sizes = [1, 64], strides = [1, 1]} : vector<1x256xf32> to vector<1x64xf32>
    %83 = vector.extract_strided_slice %78 {offsets = [0, 192], sizes = [1, 64], strides = [1, 1]} : vector<1x256xf32> to vector<1x64xf32>
    %84 = arith.mulf %81, %66 : vector<1x64xf32>
    %85 = arith.mulf %80, %82 : vector<1x64xf32>
    %86 = arith.addf %84, %85 : vector<1x64xf32>
    %87 = math.tanh %86 : vector<1x64xf32>
    %88 = arith.mulf %83, %87 : vector<1x64xf32>
    %c3_30 = arith.constant 3 : index
    %c0_31 = arith.constant 0 : index
    %89 = vector.load %arg10[%c3_30, %c0_31] : memref<16x64xf32, #tpu.memory_space<vmem>>, vector<1x64xf32>
    tpu.vector_store %arg10[%c3_30, %c0_31], %88 {strides = array<i32>} : memref<16x64xf32, #tpu.memory_space<vmem>>, vector<1x64xf32>,
    %90 = arith.truncf %88 : vector<1x64xf32> to vector<1x64xbf16>
    %cst_32 = arith.constant dense<0.000000e+00> : vector<1x256xf32>
    %91 = tpu.matmul %90, %7, %cst_32 {dimension_numbers = #tpu.dot_dimension_numbers<[1], [0], [0], [1], [0, 0, 1, 1], [], []>} : vector<1x64xbf16>, vector<64x256xbf16>, vector<1x256xf32> -> vector<1x256xf32>
    %c4 = arith.constant 4 : index
    %c0_33 = arith.constant 0 : index
    %92 = vector.load %arg9[%c4, %c0_33] : memref<16x256xf32, #tpu.memory_space<vmem>>, vector<1x256xf32>
    %93 = arith.addf %91, %92 : vector<1x256xf32>
    %94 = arith.negf %93 : vector<1x256xf32>
    %95 = math.exp %94 : vector<1x256xf32>
    %cst_34 = arith.constant 1.000000e+00 : f32
    %96 = vector.broadcast %cst_34 : f32 to vector<1x256xf32>
    %97 = arith.addf %96, %95 : vector<1x256xf32>
    %98 = arith.divf %96, %97 : vector<1x256xf32>
    %99 = math.tanh %93 : vector<1x256xf32>
    %100 = vector.extract_strided_slice %98 {offsets = [0, 0], sizes = [1, 64], strides = [1, 1]} : vector<1x256xf32> to vector<1x64xf32>
    %101 = vector.extract_strided_slice %98 {offsets = [0, 64], sizes = [1, 64], strides = [1, 1]} : vector<1x256xf32> to vector<1x64xf32>
    %102 = vector.extract_strided_slice %99 {offsets = [0, 128], sizes = [1, 64], strides = [1, 1]} : vector<1x256xf32> to vector<1x64xf32>
    %103 = vector.extract_strided_slice %98 {offsets = [0, 192], sizes = [1, 64], strides = [1, 1]} : vector<1x256xf32> to vector<1x64xf32>
    %104 = arith.mulf %101, %86 : vector<1x64xf32>
    %105 = arith.mulf %100, %102 : vector<1x64xf32>
    %106 = arith.addf %104, %105 : vector<1x64xf32>
    %107 = math.tanh %106 : vector<1x64xf32>
    %108 = arith.mulf %103, %107 : vector<1x64xf32>
    %c4_35 = arith.constant 4 : index
    %c0_36 = arith.constant 0 : index
    %109 = vector.load %arg10[%c4_35, %c0_36] : memref<16x64xf32, #tpu.memory_space<vmem>>, vector<1x64xf32>
    tpu.vector_store %arg10[%c4_35, %c0_36], %108 {strides = array<i32>} : memref<16x64xf32, #tpu.memory_space<vmem>>, vector<1x64xf32>,
    %110 = arith.truncf %108 : vector<1x64xf32> to vector<1x64xbf16>
    %cst_37 = arith.constant dense<0.000000e+00> : vector<1x256xf32>
    %111 = tpu.matmul %110, %7, %cst_37 {dimension_numbers = #tpu.dot_dimension_numbers<[1], [0], [0], [1], [0, 0, 1, 1], [], []>} : vector<1x64xbf16>, vector<64x256xbf16>, vector<1x256xf32> -> vector<1x256xf32>
    %c5 = arith.constant 5 : index
    %c0_38 = arith.constant 0 : index
    %112 = vector.load %arg9[%c5, %c0_38] : memref<16x256xf32, #tpu.memory_space<vmem>>, vector<1x256xf32>
    %113 = arith.addf %111, %112 : vector<1x256xf32>
    %114 = arith.negf %113 : vector<1x256xf32>
    %115 = math.exp %114 : vector<1x256xf32>
    %cst_39 = arith.constant 1.000000e+00 : f32
    %116 = vector.broadcast %cst_39 : f32 to vector<1x256xf32>
    %117 = arith.addf %116, %115 : vector<1x256xf32>
    %118 = arith.divf %116, %117 : vector<1x256xf32>
    %119 = math.tanh %113 : vector<1x256xf32>
    %120 = vector.extract_strided_slice %118 {offsets = [0, 0], sizes = [1, 64], strides = [1, 1]} : vector<1x256xf32> to vector<1x64xf32>
    %121 = vector.extract_strided_slice %118 {offsets = [0, 64], sizes = [1, 64], strides = [1, 1]} : vector<1x256xf32> to vector<1x64xf32>
    %122 = vector.extract_strided_slice %119 {offsets = [0, 128], sizes = [1, 64], strides = [1, 1]} : vector<1x256xf32> to vector<1x64xf32>
    %123 = vector.extract_strided_slice %118 {offsets = [0, 192], sizes = [1, 64], strides = [1, 1]} : vector<1x256xf32> to vector<1x64xf32>
    %124 = arith.mulf %121, %106 : vector<1x64xf32>
    %125 = arith.mulf %120, %122 : vector<1x64xf32>
    %126 = arith.addf %124, %125 : vector<1x64xf32>
    %127 = math.tanh %126 : vector<1x64xf32>
    %128 = arith.mulf %123, %127 : vector<1x64xf32>
    %c5_40 = arith.constant 5 : index
    %c0_41 = arith.constant 0 : index
    %129 = vector.load %arg10[%c5_40, %c0_41] : memref<16x64xf32, #tpu.memory_space<vmem>>, vector<1x64xf32>
    tpu.vector_store %arg10[%c5_40, %c0_41], %128 {strides = array<i32>} : memref<16x64xf32, #tpu.memory_space<vmem>>, vector<1x64xf32>,
    %130 = arith.truncf %128 : vector<1x64xf32> to vector<1x64xbf16>
    %cst_42 = arith.constant dense<0.000000e+00> : vector<1x256xf32>
    %131 = tpu.matmul %130, %7, %cst_42 {dimension_numbers = #tpu.dot_dimension_numbers<[1], [0], [0], [1], [0, 0, 1, 1], [], []>} : vector<1x64xbf16>, vector<64x256xbf16>, vector<1x256xf32> -> vector<1x256xf32>
    %c6 = arith.constant 6 : index
    %c0_43 = arith.constant 0 : index
    %132 = vector.load %arg9[%c6, %c0_43] : memref<16x256xf32, #tpu.memory_space<vmem>>, vector<1x256xf32>
    %133 = arith.addf %131, %132 : vector<1x256xf32>
    %134 = arith.negf %133 : vector<1x256xf32>
    %135 = math.exp %134 : vector<1x256xf32>
    %cst_44 = arith.constant 1.000000e+00 : f32
    %136 = vector.broadcast %cst_44 : f32 to vector<1x256xf32>
    %137 = arith.addf %136, %135 : vector<1x256xf32>
    %138 = arith.divf %136, %137 : vector<1x256xf32>
    %139 = math.tanh %133 : vector<1x256xf32>
    %140 = vector.extract_strided_slice %138 {offsets = [0, 0], sizes = [1, 64], strides = [1, 1]} : vector<1x256xf32> to vector<1x64xf32>
    %141 = vector.extract_strided_slice %138 {offsets = [0, 64], sizes = [1, 64], strides = [1, 1]} : vector<1x256xf32> to vector<1x64xf32>
    %142 = vector.extract_strided_slice %139 {offsets = [0, 128], sizes = [1, 64], strides = [1, 1]} : vector<1x256xf32> to vector<1x64xf32>
    %143 = vector.extract_strided_slice %138 {offsets = [0, 192], sizes = [1, 64], strides = [1, 1]} : vector<1x256xf32> to vector<1x64xf32>
    %144 = arith.mulf %141, %126 : vector<1x64xf32>
    %145 = arith.mulf %140, %142 : vector<1x64xf32>
    %146 = arith.addf %144, %145 : vector<1x64xf32>
    %147 = math.tanh %146 : vector<1x64xf32>
    %148 = arith.mulf %143, %147 : vector<1x64xf32>
    %c6_45 = arith.constant 6 : index
    %c0_46 = arith.constant 0 : index
    %149 = vector.load %arg10[%c6_45, %c0_46] : memref<16x64xf32, #tpu.memory_space<vmem>>, vector<1x64xf32>
    tpu.vector_store %arg10[%c6_45, %c0_46], %148 {strides = array<i32>} : memref<16x64xf32, #tpu.memory_space<vmem>>, vector<1x64xf32>,
    %150 = arith.truncf %148 : vector<1x64xf32> to vector<1x64xbf16>
    %cst_47 = arith.constant dense<0.000000e+00> : vector<1x256xf32>
    %151 = tpu.matmul %150, %7, %cst_47 {dimension_numbers = #tpu.dot_dimension_numbers<[1], [0], [0], [1], [0, 0, 1, 1], [], []>} : vector<1x64xbf16>, vector<64x256xbf16>, vector<1x256xf32> -> vector<1x256xf32>
    %c7 = arith.constant 7 : index
    %c0_48 = arith.constant 0 : index
    %152 = vector.load %arg9[%c7, %c0_48] : memref<16x256xf32, #tpu.memory_space<vmem>>, vector<1x256xf32>
    %153 = arith.addf %151, %152 : vector<1x256xf32>
    %154 = arith.negf %153 : vector<1x256xf32>
    %155 = math.exp %154 : vector<1x256xf32>
    %cst_49 = arith.constant 1.000000e+00 : f32
    %156 = vector.broadcast %cst_49 : f32 to vector<1x256xf32>
    %157 = arith.addf %156, %155 : vector<1x256xf32>
    %158 = arith.divf %156, %157 : vector<1x256xf32>
    %159 = math.tanh %153 : vector<1x256xf32>
    %160 = vector.extract_strided_slice %158 {offsets = [0, 0], sizes = [1, 64], strides = [1, 1]} : vector<1x256xf32> to vector<1x64xf32>
    %161 = vector.extract_strided_slice %158 {offsets = [0, 64], sizes = [1, 64], strides = [1, 1]} : vector<1x256xf32> to vector<1x64xf32>
    %162 = vector.extract_strided_slice %159 {offsets = [0, 128], sizes = [1, 64], strides = [1, 1]} : vector<1x256xf32> to vector<1x64xf32>
    %163 = vector.extract_strided_slice %158 {offsets = [0, 192], sizes = [1, 64], strides = [1, 1]} : vector<1x256xf32> to vector<1x64xf32>
    %164 = arith.mulf %161, %146 : vector<1x64xf32>
    %165 = arith.mulf %160, %162 : vector<1x64xf32>
    %166 = arith.addf %164, %165 : vector<1x64xf32>
    %167 = math.tanh %166 : vector<1x64xf32>
    %168 = arith.mulf %163, %167 : vector<1x64xf32>
    %c7_50 = arith.constant 7 : index
    %c0_51 = arith.constant 0 : index
    %169 = vector.load %arg10[%c7_50, %c0_51] : memref<16x64xf32, #tpu.memory_space<vmem>>, vector<1x64xf32>
    tpu.vector_store %arg10[%c7_50, %c0_51], %168 {strides = array<i32>} : memref<16x64xf32, #tpu.memory_space<vmem>>, vector<1x64xf32>,
    %170 = arith.truncf %168 : vector<1x64xf32> to vector<1x64xbf16>
    %cst_52 = arith.constant dense<0.000000e+00> : vector<1x256xf32>
    %171 = tpu.matmul %170, %7, %cst_52 {dimension_numbers = #tpu.dot_dimension_numbers<[1], [0], [0], [1], [0, 0, 1, 1], [], []>} : vector<1x64xbf16>, vector<64x256xbf16>, vector<1x256xf32> -> vector<1x256xf32>
    %c8 = arith.constant 8 : index
    %c0_53 = arith.constant 0 : index
    %172 = vector.load %arg9[%c8, %c0_53] : memref<16x256xf32, #tpu.memory_space<vmem>>, vector<1x256xf32>
    %173 = arith.addf %171, %172 : vector<1x256xf32>
    %174 = arith.negf %173 : vector<1x256xf32>
    %175 = math.exp %174 : vector<1x256xf32>
    %cst_54 = arith.constant 1.000000e+00 : f32
    %176 = vector.broadcast %cst_54 : f32 to vector<1x256xf32>
    %177 = arith.addf %176, %175 : vector<1x256xf32>
    %178 = arith.divf %176, %177 : vector<1x256xf32>
    %179 = math.tanh %173 : vector<1x256xf32>
    %180 = vector.extract_strided_slice %178 {offsets = [0, 0], sizes = [1, 64], strides = [1, 1]} : vector<1x256xf32> to vector<1x64xf32>
    %181 = vector.extract_strided_slice %178 {offsets = [0, 64], sizes = [1, 64], strides = [1, 1]} : vector<1x256xf32> to vector<1x64xf32>
    %182 = vector.extract_strided_slice %179 {offsets = [0, 128], sizes = [1, 64], strides = [1, 1]} : vector<1x256xf32> to vector<1x64xf32>
    %183 = vector.extract_strided_slice %178 {offsets = [0, 192], sizes = [1, 64], strides = [1, 1]} : vector<1x256xf32> to vector<1x64xf32>
    %184 = arith.mulf %181, %166 : vector<1x64xf32>
    %185 = arith.mulf %180, %182 : vector<1x64xf32>
    %186 = arith.addf %184, %185 : vector<1x64xf32>
    %187 = math.tanh %186 : vector<1x64xf32>
    %188 = arith.mulf %183, %187 : vector<1x64xf32>
    %c8_55 = arith.constant 8 : index
    %c0_56 = arith.constant 0 : index
    %189 = vector.load %arg10[%c8_55, %c0_56] : memref<16x64xf32, #tpu.memory_space<vmem>>, vector<1x64xf32>
    tpu.vector_store %arg10[%c8_55, %c0_56], %188 {strides = array<i32>} : memref<16x64xf32, #tpu.memory_space<vmem>>, vector<1x64xf32>,
    %190 = arith.truncf %188 : vector<1x64xf32> to vector<1x64xbf16>
    %cst_57 = arith.constant dense<0.000000e+00> : vector<1x256xf32>
    %191 = tpu.matmul %190, %7, %cst_57 {dimension_numbers = #tpu.dot_dimension_numbers<[1], [0], [0], [1], [0, 0, 1, 1], [], []>} : vector<1x64xbf16>, vector<64x256xbf16>, vector<1x256xf32> -> vector<1x256xf32>
    %c9 = arith.constant 9 : index
    %c0_58 = arith.constant 0 : index
    %192 = vector.load %arg9[%c9, %c0_58] : memref<16x256xf32, #tpu.memory_space<vmem>>, vector<1x256xf32>
    %193 = arith.addf %191, %192 : vector<1x256xf32>
    %194 = arith.negf %193 : vector<1x256xf32>
    %195 = math.exp %194 : vector<1x256xf32>
    %cst_59 = arith.constant 1.000000e+00 : f32
    %196 = vector.broadcast %cst_59 : f32 to vector<1x256xf32>
    %197 = arith.addf %196, %195 : vector<1x256xf32>
    %198 = arith.divf %196, %197 : vector<1x256xf32>
    %199 = math.tanh %193 : vector<1x256xf32>
    %200 = vector.extract_strided_slice %198 {offsets = [0, 0], sizes = [1, 64], strides = [1, 1]} : vector<1x256xf32> to vector<1x64xf32>
    %201 = vector.extract_strided_slice %198 {offsets = [0, 64], sizes = [1, 64], strides = [1, 1]} : vector<1x256xf32> to vector<1x64xf32>
    %202 = vector.extract_strided_slice %199 {offsets = [0, 128], sizes = [1, 64], strides = [1, 1]} : vector<1x256xf32> to vector<1x64xf32>
    %203 = vector.extract_strided_slice %198 {offsets = [0, 192], sizes = [1, 64], strides = [1, 1]} : vector<1x256xf32> to vector<1x64xf32>
    %204 = arith.mulf %201, %186 : vector<1x64xf32>
    %205 = arith.mulf %200, %202 : vector<1x64xf32>
    %206 = arith.addf %204, %205 : vector<1x64xf32>
    %207 = math.tanh %206 : vector<1x64xf32>
    %208 = arith.mulf %203, %207 : vector<1x64xf32>
    %c9_60 = arith.constant 9 : index
    %c0_61 = arith.constant 0 : index
    %209 = vector.load %arg10[%c9_60, %c0_61] : memref<16x64xf32, #tpu.memory_space<vmem>>, vector<1x64xf32>
    tpu.vector_store %arg10[%c9_60, %c0_61], %208 {strides = array<i32>} : memref<16x64xf32, #tpu.memory_space<vmem>>, vector<1x64xf32>,
    %210 = arith.truncf %208 : vector<1x64xf32> to vector<1x64xbf16>
    %cst_62 = arith.constant dense<0.000000e+00> : vector<1x256xf32>
    %211 = tpu.matmul %210, %7, %cst_62 {dimension_numbers = #tpu.dot_dimension_numbers<[1], [0], [0], [1], [0, 0, 1, 1], [], []>} : vector<1x64xbf16>, vector<64x256xbf16>, vector<1x256xf32> -> vector<1x256xf32>
    %c10 = arith.constant 10 : index
    %c0_63 = arith.constant 0 : index
    %212 = vector.load %arg9[%c10, %c0_63] : memref<16x256xf32, #tpu.memory_space<vmem>>, vector<1x256xf32>
    %213 = arith.addf %211, %212 : vector<1x256xf32>
    %214 = arith.negf %213 : vector<1x256xf32>
    %215 = math.exp %214 : vector<1x256xf32>
    %cst_64 = arith.constant 1.000000e+00 : f32
    %216 = vector.broadcast %cst_64 : f32 to vector<1x256xf32>
    %217 = arith.addf %216, %215 : vector<1x256xf32>
    %218 = arith.divf %216, %217 : vector<1x256xf32>
    %219 = math.tanh %213 : vector<1x256xf32>
    %220 = vector.extract_strided_slice %218 {offsets = [0, 0], sizes = [1, 64], strides = [1, 1]} : vector<1x256xf32> to vector<1x64xf32>
    %221 = vector.extract_strided_slice %218 {offsets = [0, 64], sizes = [1, 64], strides = [1, 1]} : vector<1x256xf32> to vector<1x64xf32>
    %222 = vector.extract_strided_slice %219 {offsets = [0, 128], sizes = [1, 64], strides = [1, 1]} : vector<1x256xf32> to vector<1x64xf32>
    %223 = vector.extract_strided_slice %218 {offsets = [0, 192], sizes = [1, 64], strides = [1, 1]} : vector<1x256xf32> to vector<1x64xf32>
    %224 = arith.mulf %221, %206 : vector<1x64xf32>
    %225 = arith.mulf %220, %222 : vector<1x64xf32>
    %226 = arith.addf %224, %225 : vector<1x64xf32>
    %227 = math.tanh %226 : vector<1x64xf32>
    %228 = arith.mulf %223, %227 : vector<1x64xf32>
    %c10_65 = arith.constant 10 : index
    %c0_66 = arith.constant 0 : index
    %229 = vector.load %arg10[%c10_65, %c0_66] : memref<16x64xf32, #tpu.memory_space<vmem>>, vector<1x64xf32>
    tpu.vector_store %arg10[%c10_65, %c0_66], %228 {strides = array<i32>} : memref<16x64xf32, #tpu.memory_space<vmem>>, vector<1x64xf32>,
    %230 = arith.truncf %228 : vector<1x64xf32> to vector<1x64xbf16>
    %cst_67 = arith.constant dense<0.000000e+00> : vector<1x256xf32>
    %231 = tpu.matmul %230, %7, %cst_67 {dimension_numbers = #tpu.dot_dimension_numbers<[1], [0], [0], [1], [0, 0, 1, 1], [], []>} : vector<1x64xbf16>, vector<64x256xbf16>, vector<1x256xf32> -> vector<1x256xf32>
    %c11 = arith.constant 11 : index
    %c0_68 = arith.constant 0 : index
    %232 = vector.load %arg9[%c11, %c0_68] : memref<16x256xf32, #tpu.memory_space<vmem>>, vector<1x256xf32>
    %233 = arith.addf %231, %232 : vector<1x256xf32>
    %234 = arith.negf %233 : vector<1x256xf32>
    %235 = math.exp %234 : vector<1x256xf32>
    %cst_69 = arith.constant 1.000000e+00 : f32
    %236 = vector.broadcast %cst_69 : f32 to vector<1x256xf32>
    %237 = arith.addf %236, %235 : vector<1x256xf32>
    %238 = arith.divf %236, %237 : vector<1x256xf32>
    %239 = math.tanh %233 : vector<1x256xf32>
    %240 = vector.extract_strided_slice %238 {offsets = [0, 0], sizes = [1, 64], strides = [1, 1]} : vector<1x256xf32> to vector<1x64xf32>
    %241 = vector.extract_strided_slice %238 {offsets = [0, 64], sizes = [1, 64], strides = [1, 1]} : vector<1x256xf32> to vector<1x64xf32>
    %242 = vector.extract_strided_slice %239 {offsets = [0, 128], sizes = [1, 64], strides = [1, 1]} : vector<1x256xf32> to vector<1x64xf32>
    %243 = vector.extract_strided_slice %238 {offsets = [0, 192], sizes = [1, 64], strides = [1, 1]} : vector<1x256xf32> to vector<1x64xf32>
    %244 = arith.mulf %241, %226 : vector<1x64xf32>
    %245 = arith.mulf %240, %242 : vector<1x64xf32>
    %246 = arith.addf %244, %245 : vector<1x64xf32>
    %247 = math.tanh %246 : vector<1x64xf32>
    %248 = arith.mulf %243, %247 : vector<1x64xf32>
    %c11_70 = arith.constant 11 : index
    %c0_71 = arith.constant 0 : index
    %249 = vector.load %arg10[%c11_70, %c0_71] : memref<16x64xf32, #tpu.memory_space<vmem>>, vector<1x64xf32>
    tpu.vector_store %arg10[%c11_70, %c0_71], %248 {strides = array<i32>} : memref<16x64xf32, #tpu.memory_space<vmem>>, vector<1x64xf32>,
    %250 = arith.truncf %248 : vector<1x64xf32> to vector<1x64xbf16>
    %cst_72 = arith.constant dense<0.000000e+00> : vector<1x256xf32>
    %251 = tpu.matmul %250, %7, %cst_72 {dimension_numbers = #tpu.dot_dimension_numbers<[1], [0], [0], [1], [0, 0, 1, 1], [], []>} : vector<1x64xbf16>, vector<64x256xbf16>, vector<1x256xf32> -> vector<1x256xf32>
    %c12 = arith.constant 12 : index
    %c0_73 = arith.constant 0 : index
    %252 = vector.load %arg9[%c12, %c0_73] : memref<16x256xf32, #tpu.memory_space<vmem>>, vector<1x256xf32>
    %253 = arith.addf %251, %252 : vector<1x256xf32>
    %254 = arith.negf %253 : vector<1x256xf32>
    %255 = math.exp %254 : vector<1x256xf32>
    %cst_74 = arith.constant 1.000000e+00 : f32
    %256 = vector.broadcast %cst_74 : f32 to vector<1x256xf32>
    %257 = arith.addf %256, %255 : vector<1x256xf32>
    %258 = arith.divf %256, %257 : vector<1x256xf32>
    %259 = math.tanh %253 : vector<1x256xf32>
    %260 = vector.extract_strided_slice %258 {offsets = [0, 0], sizes = [1, 64], strides = [1, 1]} : vector<1x256xf32> to vector<1x64xf32>
    %261 = vector.extract_strided_slice %258 {offsets = [0, 64], sizes = [1, 64], strides = [1, 1]} : vector<1x256xf32> to vector<1x64xf32>
    %262 = vector.extract_strided_slice %259 {offsets = [0, 128], sizes = [1, 64], strides = [1, 1]} : vector<1x256xf32> to vector<1x64xf32>
    %263 = vector.extract_strided_slice %258 {offsets = [0, 192], sizes = [1, 64], strides = [1, 1]} : vector<1x256xf32> to vector<1x64xf32>
    %264 = arith.mulf %261, %246 : vector<1x64xf32>
    %265 = arith.mulf %260, %262 : vector<1x64xf32>
    %266 = arith.addf %264, %265 : vector<1x64xf32>
    %267 = math.tanh %266 : vector<1x64xf32>
    %268 = arith.mulf %263, %267 : vector<1x64xf32>
    %c12_75 = arith.constant 12 : index
    %c0_76 = arith.constant 0 : index
    %269 = vector.load %arg10[%c12_75, %c0_76] : memref<16x64xf32, #tpu.memory_space<vmem>>, vector<1x64xf32>
    tpu.vector_store %arg10[%c12_75, %c0_76], %268 {strides = array<i32>} : memref<16x64xf32, #tpu.memory_space<vmem>>, vector<1x64xf32>,
    %270 = arith.truncf %268 : vector<1x64xf32> to vector<1x64xbf16>
    %cst_77 = arith.constant dense<0.000000e+00> : vector<1x256xf32>
    %271 = tpu.matmul %270, %7, %cst_77 {dimension_numbers = #tpu.dot_dimension_numbers<[1], [0], [0], [1], [0, 0, 1, 1], [], []>} : vector<1x64xbf16>, vector<64x256xbf16>, vector<1x256xf32> -> vector<1x256xf32>
    %c13 = arith.constant 13 : index
    %c0_78 = arith.constant 0 : index
    %272 = vector.load %arg9[%c13, %c0_78] : memref<16x256xf32, #tpu.memory_space<vmem>>, vector<1x256xf32>
    %273 = arith.addf %271, %272 : vector<1x256xf32>
    %274 = arith.negf %273 : vector<1x256xf32>
    %275 = math.exp %274 : vector<1x256xf32>
    %cst_79 = arith.constant 1.000000e+00 : f32
    %276 = vector.broadcast %cst_79 : f32 to vector<1x256xf32>
    %277 = arith.addf %276, %275 : vector<1x256xf32>
    %278 = arith.divf %276, %277 : vector<1x256xf32>
    %279 = math.tanh %273 : vector<1x256xf32>
    %280 = vector.extract_strided_slice %278 {offsets = [0, 0], sizes = [1, 64], strides = [1, 1]} : vector<1x256xf32> to vector<1x64xf32>
    %281 = vector.extract_strided_slice %278 {offsets = [0, 64], sizes = [1, 64], strides = [1, 1]} : vector<1x256xf32> to vector<1x64xf32>
    %282 = vector.extract_strided_slice %279 {offsets = [0, 128], sizes = [1, 64], strides = [1, 1]} : vector<1x256xf32> to vector<1x64xf32>
    %283 = vector.extract_strided_slice %278 {offsets = [0, 192], sizes = [1, 64], strides = [1, 1]} : vector<1x256xf32> to vector<1x64xf32>
    %284 = arith.mulf %281, %266 : vector<1x64xf32>
    %285 = arith.mulf %280, %282 : vector<1x64xf32>
    %286 = arith.addf %284, %285 : vector<1x64xf32>
    %287 = math.tanh %286 : vector<1x64xf32>
    %288 = arith.mulf %283, %287 : vector<1x64xf32>
    %c13_80 = arith.constant 13 : index
    %c0_81 = arith.constant 0 : index
    %289 = vector.load %arg10[%c13_80, %c0_81] : memref<16x64xf32, #tpu.memory_space<vmem>>, vector<1x64xf32>
    tpu.vector_store %arg10[%c13_80, %c0_81], %288 {strides = array<i32>} : memref<16x64xf32, #tpu.memory_space<vmem>>, vector<1x64xf32>,
    %290 = arith.truncf %288 : vector<1x64xf32> to vector<1x64xbf16>
    %cst_82 = arith.constant dense<0.000000e+00> : vector<1x256xf32>
    %291 = tpu.matmul %290, %7, %cst_82 {dimension_numbers = #tpu.dot_dimension_numbers<[1], [0], [0], [1], [0, 0, 1, 1], [], []>} : vector<1x64xbf16>, vector<64x256xbf16>, vector<1x256xf32> -> vector<1x256xf32>
    %c14 = arith.constant 14 : index
    %c0_83 = arith.constant 0 : index
    %292 = vector.load %arg9[%c14, %c0_83] : memref<16x256xf32, #tpu.memory_space<vmem>>, vector<1x256xf32>
    %293 = arith.addf %291, %292 : vector<1x256xf32>
    %294 = arith.negf %293 : vector<1x256xf32>
    %295 = math.exp %294 : vector<1x256xf32>
    %cst_84 = arith.constant 1.000000e+00 : f32
    %296 = vector.broadcast %cst_84 : f32 to vector<1x256xf32>
    %297 = arith.addf %296, %295 : vector<1x256xf32>
    %298 = arith.divf %296, %297 : vector<1x256xf32>
    %299 = math.tanh %293 : vector<1x256xf32>
    %300 = vector.extract_strided_slice %298 {offsets = [0, 0], sizes = [1, 64], strides = [1, 1]} : vector<1x256xf32> to vector<1x64xf32>
    %301 = vector.extract_strided_slice %298 {offsets = [0, 64], sizes = [1, 64], strides = [1, 1]} : vector<1x256xf32> to vector<1x64xf32>
    %302 = vector.extract_strided_slice %299 {offsets = [0, 128], sizes = [1, 64], strides = [1, 1]} : vector<1x256xf32> to vector<1x64xf32>
    %303 = vector.extract_strided_slice %298 {offsets = [0, 192], sizes = [1, 64], strides = [1, 1]} : vector<1x256xf32> to vector<1x64xf32>
    %304 = arith.mulf %301, %286 : vector<1x64xf32>
    %305 = arith.mulf %300, %302 : vector<1x64xf32>
    %306 = arith.addf %304, %305 : vector<1x64xf32>
    %307 = math.tanh %306 : vector<1x64xf32>
    %308 = arith.mulf %303, %307 : vector<1x64xf32>
    %c14_85 = arith.constant 14 : index
    %c0_86 = arith.constant 0 : index
    %309 = vector.load %arg10[%c14_85, %c0_86] : memref<16x64xf32, #tpu.memory_space<vmem>>, vector<1x64xf32>
    tpu.vector_store %arg10[%c14_85, %c0_86], %308 {strides = array<i32>} : memref<16x64xf32, #tpu.memory_space<vmem>>, vector<1x64xf32>,
    %310 = arith.truncf %308 : vector<1x64xf32> to vector<1x64xbf16>
    %cst_87 = arith.constant dense<0.000000e+00> : vector<1x256xf32>
    %311 = tpu.matmul %310, %7, %cst_87 {dimension_numbers = #tpu.dot_dimension_numbers<[1], [0], [0], [1], [0, 0, 1, 1], [], []>} : vector<1x64xbf16>, vector<64x256xbf16>, vector<1x256xf32> -> vector<1x256xf32>
    %c15 = arith.constant 15 : index
    %c0_88 = arith.constant 0 : index
    %312 = vector.load %arg9[%c15, %c0_88] : memref<16x256xf32, #tpu.memory_space<vmem>>, vector<1x256xf32>
    %313 = arith.addf %311, %312 : vector<1x256xf32>
    %314 = arith.negf %313 : vector<1x256xf32>
    %315 = math.exp %314 : vector<1x256xf32>
    %cst_89 = arith.constant 1.000000e+00 : f32
    %316 = vector.broadcast %cst_89 : f32 to vector<1x256xf32>
    %317 = arith.addf %316, %315 : vector<1x256xf32>
    %318 = arith.divf %316, %317 : vector<1x256xf32>
    %319 = math.tanh %313 : vector<1x256xf32>
    %320 = vector.extract_strided_slice %318 {offsets = [0, 0], sizes = [1, 64], strides = [1, 1]} : vector<1x256xf32> to vector<1x64xf32>
    %321 = vector.extract_strided_slice %318 {offsets = [0, 64], sizes = [1, 64], strides = [1, 1]} : vector<1x256xf32> to vector<1x64xf32>
    %322 = vector.extract_strided_slice %319 {offsets = [0, 128], sizes = [1, 64], strides = [1, 1]} : vector<1x256xf32> to vector<1x64xf32>
    %323 = vector.extract_strided_slice %318 {offsets = [0, 192], sizes = [1, 64], strides = [1, 1]} : vector<1x256xf32> to vector<1x64xf32>
    %324 = arith.mulf %321, %306 : vector<1x64xf32>
    %325 = arith.mulf %320, %322 : vector<1x64xf32>
    %326 = arith.addf %324, %325 : vector<1x64xf32>
    %327 = math.tanh %326 : vector<1x64xf32>
    %328 = arith.mulf %323, %327 : vector<1x64xf32>
    %c15_90 = arith.constant 15 : index
    %c0_91 = arith.constant 0 : index
    %329 = vector.load %arg10[%c15_90, %c0_91] : memref<16x64xf32, #tpu.memory_space<vmem>>, vector<1x64xf32>
    tpu.vector_store %arg10[%c15_90, %c0_91], %328 {strides = array<i32>} : memref<16x64xf32, #tpu.memory_space<vmem>>, vector<1x64xf32>,
    %c0_92 = arith.constant 0 : index
    %c0_93 = arith.constant 0 : index
    %330 = vector.load %arg10[%c0_92, %c0_93] : memref<16x64xf32, #tpu.memory_space<vmem>>, vector<16x64xf32>
    %331 = vector.extract_strided_slice %330 {offsets = [0, 0], sizes = [16, 32], strides = [1, 1]} : vector<16x64xf32> to vector<16x32xf32>
    %332 = vector.extract_strided_slice %330 {offsets = [0, 32], sizes = [8, 32], strides = [1, 1]} : vector<16x64xf32> to vector<8x32xf32>
    %c0_94 = arith.constant 0 : index
    %c0_95 = arith.constant 0 : index
    %333 = vector.load %arg4[%c0_94, %c0_95] : memref<32x32xf32, #tpu.memory_space<vmem>>, vector<32x32xf32>
    %cst_96 = arith.constant dense<0.000000e+00> : vector<16x32xf32>
    %334 = tpu.matmul %331, %333, %cst_96 {dimension_numbers = #tpu.dot_dimension_numbers<[1], [0], [0], [1], [0, 0, 1, 1], [], []>} : vector<16x32xf32>, vector<32x32xf32>, vector<16x32xf32> -> vector<16x32xf32>
    %c0_97 = arith.constant 0 : index
    %c0_98 = arith.constant 0 : index
    %335 = vector.load %arg5[%c0_97, %c0_98] : memref<1x32xf32, #tpu.memory_space<vmem>>, vector<1x32xf32>
    %336 = vector.broadcast %335 : vector<1x32xf32> to vector<16x32xf32>
    %337 = arith.addf %334, %336 : vector<16x32xf32>
    %cst_99 = arith.constant 0.000000e+00 : f32
    %338 = vector.broadcast %cst_99 : f32 to vector<16x32xf32>
    %339 = arith.maximumf %337, %338 : vector<16x32xf32>
    %c0_100 = arith.constant 0 : index
    %c0_101 = arith.constant 0 : index
    %340 = vector.load %arg6[%c0_100, %c0_101] : memref<32x32xf32, #tpu.memory_space<vmem>>, vector<32x32xf32>
    %cst_102 = arith.constant dense<0.000000e+00> : vector<16x32xf32>
    %341 = tpu.matmul %339, %340, %cst_102 {dimension_numbers = #tpu.dot_dimension_numbers<[1], [0], [0], [1], [0, 0, 1, 1], [], []>} : vector<16x32xf32>, vector<32x32xf32>, vector<16x32xf32> -> vector<16x32xf32>
    %c0_103 = arith.constant 0 : index
    %c0_104 = arith.constant 0 : index
    %342 = vector.load %arg7[%c0_103, %c0_104] : memref<1x32xf32, #tpu.memory_space<vmem>>, vector<1x32xf32>
    %343 = vector.broadcast %342 : vector<1x32xf32> to vector<16x32xf32>
    %344 = arith.addf %341, %343 : vector<16x32xf32>
    %c0_105 = arith.constant 0 : index
    %c0_106 = arith.constant 0 : index
    %345 = vector.load %arg4[%c0_105, %c0_106] : memref<32x32xf32, #tpu.memory_space<vmem>>, vector<32x32xf32>
    %cst_107 = arith.constant dense<0.000000e+00> : vector<8x32xf32>
    %346 = tpu.matmul %332, %345, %cst_107 {dimension_numbers = #tpu.dot_dimension_numbers<[1], [0], [0], [1], [0, 0, 1, 1], [], []>} : vector<8x32xf32>, vector<32x32xf32>, vector<8x32xf32> -> vector<8x32xf32>
    %c0_108 = arith.constant 0 : index
    %c0_109 = arith.constant 0 : index
    %347 = vector.load %arg5[%c0_108, %c0_109] : memref<1x32xf32, #tpu.memory_space<vmem>>, vector<1x32xf32>
    %348 = vector.broadcast %347 : vector<1x32xf32> to vector<8x32xf32>
    %349 = arith.addf %346, %348 : vector<8x32xf32>
    %cst_110 = arith.constant 0.000000e+00 : f32
    %350 = vector.broadcast %cst_110 : f32 to vector<8x32xf32>
    %351 = arith.maximumf %349, %350 : vector<8x32xf32>
    %c0_111 = arith.constant 0 : index
    %c0_112 = arith.constant 0 : index
    %352 = vector.load %arg6[%c0_111, %c0_112] : memref<32x32xf32, #tpu.memory_space<vmem>>, vector<32x32xf32>
    %cst_113 = arith.constant dense<0.000000e+00> : vector<8x32xf32>
    %353 = tpu.matmul %351, %352, %cst_113 {dimension_numbers = #tpu.dot_dimension_numbers<[1], [0], [0], [1], [0, 0, 1, 1], [], []>} : vector<8x32xf32>, vector<32x32xf32>, vector<8x32xf32> -> vector<8x32xf32>
    %c0_114 = arith.constant 0 : index
    %c0_115 = arith.constant 0 : index
    %354 = vector.load %arg7[%c0_114, %c0_115] : memref<1x32xf32, #tpu.memory_space<vmem>>, vector<1x32xf32>
    %355 = vector.broadcast %354 : vector<1x32xf32> to vector<8x32xf32>
    %356 = arith.addf %353, %355 : vector<8x32xf32>
    %cst_116 = arith.constant dense<0.000000e+00> : vector<32xf32>
    %357 = vector.multi_reduction <add>, %344, %cst_116 [0] : vector<16x32xf32> to vector<32xf32>
    %358 = vector.shape_cast %357 : vector<32xf32> to vector<1x32xf32>
    %cst_117 = arith.constant 1.600000e+01 : f32
    %359 = vector.broadcast %cst_117 : f32 to vector<1x32xf32>
    %360 = arith.divf %358, %359 : vector<1x32xf32>
    %cst_118 = arith.constant dense<0.000000e+00> : vector<1x8xf32>
    %361 = tpu.matmul %360, %356, %cst_118 {dimension_numbers = #tpu.dot_dimension_numbers<[1], [1], [0], [0], [0, 0, 1, 0], [], []>} : vector<1x32xf32>, vector<8x32xf32>, vector<1x8xf32> -> vector<1x8xf32>
    %c0_119 = arith.constant 0 : index
    %c0_120 = arith.constant 0 : index
    %362 = vector.load %arg8[%c0_119, %c0_120] : memref<1x8xf32, #tpu.memory_space<vmem>>, vector<1x8xf32>
    tpu.vector_store %arg8[%c0_119, %c0_120], %361 {strides = array<i32>} : memref<1x8xf32, #tpu.memory_space<vmem>>, vector<1x8xf32>,
    return
  }
}

</mosaic_0001>

<bundles_post_ra>
// kernel: tpu_custom_call.1
= control target key start
LH: loop header
LB: loop body
LE: loop exit
PB: predicated region body
PF: predicated region fallthrough
CT: control target
= control target key end

     0   :  { %13 = vsyncpa [#allocation5], 0  ;;  %s3078_s0 = inlined_call_operand.vmem [shape: f32[16,8], index: 0, kind: input, shape index: {}]   ;;  %s3079_s1 = inlined_call_operand.hbm [shape: f32[8,256], index: 1, kind: input, shape index: {}]   ;;  %s3080_s2 = inlined_call_operand.hbm [shape: bf16[64,256], index: 2, kind: input, shape index: {}]   ;;  %s3081_s3 = inlined_call_operand.vmem [shape: f32[1,256], index: 3, kind: input, shape index: {}]   ;;  %s3082_s4 = inlined_call_operand.vmem [shape: f32[32,32], index: 4, kind: input, shape index: {}]   ;;  %s3083_s5 = inlined_call_operand.vmem [shape: f32[1,32], index: 5, kind: input, shape index: {}]   ;;  %s3084_s6 = inlined_call_operand.hbm [shape: f32[32,32], index: 6, kind: input, shape index: {}]   ;;  %s3085_s7 = inlined_call_operand.vmem [shape: f32[1,32], index: 7, kind: input, shape index: {}]   ;;  %s3086_s8 = inlined_call_operand.hbm [shape: f32[1,8], index: 8, kind: output, shape index: {}]  }
   0x1   :  { %14 = vsyncpa [#allocation8], 0 }
   0x2   :  { %15 = vsyncpa [#allocation6], 0  ;;  %s2555_s27 = smov [#allocation7]   ;;  %s2461_s9 = scalar_lea.hbm %s3080_s2, 1024 }
   0x3   :  { %s33_s28 = sshll.u32 %s2555_s27, 4  ;;  %p2462_p0 = scmp.ne.s32.totalorder %s3080_s2, %s2461_s9  ;;  %s34_s28 = int_to_ptr.vmem [resolvable:$true] %s33_s28 }
   0x4   :  { %p2465_p1 = scmp.lt.u32.totalorder %s2461_s9, %s3080_s2 }
   0x6   :  { %p2467_p2 = pnand %p2465_p1, %p2462_p0 }
   0x8   :  { %2470 = shalt.err (!%p2467_p2)
}
   0x9   :  { %s2471_s14 = scalar_lea.vmem %s34_s28, 1024  ;;  %p2476_p4 = scmp.lt.s32.totalorder %s34_s28, %s34_s28 }
   0xa   :  { %p2472_p3 = scmp.ne.s32.totalorder %s34_s28, %s2471_s14  ;;  %p2477_p5 = scmp.lt.s32.totalorder %s2471_s14, %s2471_s14 }
   0xc   :  { %p2478_p6 = por %p2477_p5, %p2476_p4 }
   0xe   :  { %p2479_p7 = pnand %p2478_p6, %p2472_p3 }
  0x10   :  { %2482 = shalt.err (!%p2479_p7)
}
  0x11   :  { %s2556_s15 = smov 128   ;;  %s2557_s16 = smov 8  }
  0x12   :  { %39 = dma.hbm_to_vmem [thread:$0]  %s3080_s2, 1024, %s34_s28, [#allocation8], %s2556_s15, %s2556_s15, %s2557_s16  }
  0x13   :  { %s2558_s19 = smov [#allocation4]   ;;  %s2559_s21 = smov [#allocation9]  }
  0x14   :  { %s24_s20 = sshll.u32 %s2558_s19, 4  ;;  %s51_s22 = sshll.u32 %s2559_s21, 4  ;;  %s25_s20 = int_to_ptr.vmem [resolvable:$true] %s24_s20  ;;  %s52_s22 = int_to_ptr.vmem [resolvable:$true] %s51_s22 }
  0x15   :  { %s2483_s25 = scalar_lea.hbm %s3079_s1, 256 }
  0x16   :  { %p2484_p8 = scmp.ne.s32.totalorder %s3079_s1, %s2483_s25  ;;  %p2487_p9 = scmp.lt.u32.totalorder %s2483_s25, %s3079_s1 }
  0x18   :  { %p2489_p10 = pnand %p2487_p9, %p2484_p8 }
  0x1a   :  { %2492 = shalt.err (!%p2489_p10)
}
  0x1b   :  { %s2493_s2 = scalar_lea.vmem %s25_s20, 256  ;;  %p2498_p12 = scmp.lt.s32.totalorder %s25_s20, %s25_s20 }
  0x1c   :  { %p2494_p11 = scmp.ne.s32.totalorder %s25_s20, %s2493_s2  ;;  %p2499_p13 = scmp.lt.s32.totalorder %s2493_s2, %s2493_s2 }
  0x1e   :  { %p2500_p0 = por %p2499_p13, %p2498_p12 }
  0x20   :  { %p2501_p1 = pnand %p2500_p0, %p2494_p11 }
  0x22   :  { %2504 = shalt.err (!%p2501_p1)
}
  0x23   :  { %27 = dma.hbm_to_vmem [thread:$0]  %s3079_s1, 256, %s25_s20, [#allocation5]  }
  0x24   :  { %s2505_s12 = scalar_lea.hbm %s3084_s6, 512 }
  0x25   :  { %p2506_p2 = scmp.ne.s32.totalorder %s3084_s6, %s2505_s12  ;;  %p2509_p3 = scmp.lt.u32.totalorder %s2505_s12, %s3084_s6 }
  0x27   :  { %p2511_p4 = pnand %p2509_p3, %p2506_p2 }
  0x29   :  { %2514 = shalt.err (!%p2511_p4)
}
  0x2a   :  { %s2515_s19 = scalar_lea.vmem %s52_s22, 512  ;;  %p2520_p6 = scmp.lt.s32.totalorder %s52_s22, %s52_s22 }
  0x2b   :  { %p2516_p5 = scmp.ne.s32.totalorder %s52_s22, %s2515_s19  ;;  %p2521_p7 = scmp.lt.s32.totalorder %s2515_s19, %s2515_s19 }
  0x2d   :  { %p2522_p8 = por %p2521_p7, %p2520_p6 }
  0x2f   :  { %p2523_p9 = pnand %p2522_p8, %p2516_p5 }
  0x31   :  { %2526 = shalt.err (!%p2523_p9)
}
  0x32   :  { %57 = dma.hbm_to_vmem [thread:$0]  %s3084_s6, 512, %s52_s22, [#allocation8], %s2556_s15, %s2556_s15, %s2557_s16  }
  0x33   :  { %2549 = dma.done.wait [#allocation5], 256  }
  0x34   :  { %2550 = vsyncadd [#allocation5], 4294967040 }
  0x35   :  { %2551 = dma.done.wait [#allocation8], 1536  }
  0x36   :  { %2552 = vsyncadd [#allocation8], 4294965760  ;;  %v2560_v0 = vmov 0.0   ;;  %v2561_v1 = vmov 0   ;;  %v73_v2 = vld [vmem:[#allocation4 + $0x8] sm:$0xff]  ;;  %vm86_vm0 = vcmask 64512   ;;  %v76_v13 = vlaneseq }
  0x37   :  { %157 = vmatprep.mubr.f32.mxu0 %v2560_v0  ;;  %270 = vmatprep.mubr.bf16.mxu1 %v2561_v1  ;;  %v2656_v3 = vld [vmem:[#allocation7 + $0x4] ss:$8 sps:$4 sm:$0xff]   ;;  %v72_v4 = vld [vmem:[#allocation4] sm:$0xff]  ;;  %v2658_v5 = vld [vmem:[#allocation7] ss:$8 sps:$4 sm:$0xff]   ;;  %vm234_vm1 = vcmask 523264  }
  0x38   :  { %93 = vmatprep.subr.mxu0 %v73_v2  ;;  %v70_v6 = vld [vmem:[%s3078_s0] sm:$0xff]  ;;  %238 = vmatprep.subr.bf16.mxu1 %v2656_v3  ;;  %v2665_v7 = vld [vmem:[#allocation7 + $0x14] ss:$8 sps:$4 sm:$0xff]   ;;  %v2668_v8 = vld [vmem:[#allocation7 + $0x10] ss:$8 sps:$4 sm:$0xff]   ;;  %v77_v14 = vshrl.u32 %v76_v13, 7 }
  0x39   :  { %94 = vmatpush1.msra.mxu0 %v72_v4  ;;  %239 = vmatpush1.bf16.msra.mxu1 %v2658_v5  ;;  %v2672_v9 = vld [vmem:[#allocation7 + $0x24] ss:$8 sps:$4 sm:$0xff]   ;;  %v2678_v10 = vld [vmem:[#allocation7 + $0x20] ss:$8 sps:$4 sm:$0xff]   ;;  %v2681_v11 = vld [vmem:[#allocation7 + $0x34] ss:$8 sps:$4 sm:$0xff]  }
  0x3a   :  { %2069 = vmatmul.mubr.msk.f32.vlgmr.msra.gmra.mrb[0].mxu0 %vm86_vm0, %v70_v6  ;;  %327 = vmatprep.subr.bf16.mxu0 %v2656_v3  ;;  %v2686_v12 = vld [vmem:[#allocation7 + $0x30] ss:$8 sps:$4 sm:$0xff]   ;;  %v2705_v15 = vsub.s32 0, %v77_v14  ;;  %v74_v16 = vld [vmem:[%s3081_s3] sm:$0x3]  ;;  %v2710_v17 = vsub.s32 1, %v77_v14 }
  0x3b   :  { %240 = vmatprep.subr.bf16.mxu1 %v2665_v7  ;;  %328 = vmatpush1.bf16.msra.mxu0 %v2658_v5  ;;  %s2562_s3 = smov 64   ;;  %v71_v39 = vld [vmem:[%s3078_s0 + $0x8] sm:$0xff]  ;;  %vm305_vm2 = vcmask 516096   ;;  %vm1640_vm3 = vcmask 261120   ;;  %vm2565_vm4 = vmmov 0   ;;  %vm2051_vm5 = vcmask 57344  }
  0x3c   :  { %329 = vmatprep.subr.bf16.mxu0 %v2665_v7  ;;  %163 = vmatprep.mubr.f32.mxu0 %v2560_v0  ;;  %v79_v18 = vrot.slane %v74_v16, %v2705_v15  ;;  %v83_v19 = vrot.slane %v74_v16, %v2710_v17 }
  0x3d   :  { %241 = vmatpush1.bf16.msra.mxu1 %v2668_v8 }
  0x3e   :  { %242 = vmatprep.subr.bf16.mxu1 %v2672_v9  ;;  %2070 = vmatmul.mubr.msk.f32.gmra.mrb[2].mxu0 %vm86_vm0, %v71_v39 }
  0x3f   :  { %330 = vmatpush1.bf16.msra.mxu0 %v2668_v8  ;;  %359 = vmatprep.mubr.bf16.mxu0 %v2561_v1 }
  0x40   :  { %331 = vmatprep.subr.bf16.mxu0 %v2672_v9 }
  0x41   :  { %243 = vmatpush1.bf16.msra.mxu1 %v2678_v10 }
  0x42   :  { %244 = vmatprep.subr.bf16.mxu1 %v2681_v11 }
  0x43   :  { %332 = vmatpush1.bf16.msra.mxu0 %v2678_v10 }
  0x44   :  { %333 = vmatprep.subr.bf16.mxu0 %v2681_v11 }
  0x45   :  { %245 = vmatpush1.bf16.msra.mxu1 %v2686_v12 }
  0x46   :  { %415 = vmatprep.subr.bf16.mxu1 %v2656_v3 }
  0x47   :  { %334 = vmatpush1.bf16.msra.mxu0 %v2686_v12 }
  0x48   :  { %503 = vmatprep.subr.bf16.mxu0 %v2656_v3  ;;  %271 = vmatmul.mubr.bf16.vlgmr.msra.gmra.mrb[0].mxu1 %v2561_v1 }
  0x49   :  { %416 = vmatpush1.bf16.msra.mxu1 %v2658_v5  ;;  %447 = vmatprep.mubr.bf16.mxu1 %v2561_v1 }
  0x4a   :  { %417 = vmatprep.subr.bf16.mxu1 %v2665_v7 }
  0x4d   :  { %418 = vmatpush1.bf16.msra.mxu1 %v2668_v8 }
  0x4e   :  { %419 = vmatprep.subr.bf16.mxu1 %v2672_v9 }
  0x51   :  { %420 = vmatpush1.bf16.msra.mxu1 %v2678_v10 }
  0x52   :  { %421 = vmatprep.subr.bf16.mxu1 %v2681_v11 }
  0x55   :  { %422 = vmatpush1.bf16.msra.mxu1 %v2686_v12 }
  0x56   :  { %591 = vmatprep.subr.bf16.mxu1 %v2656_v3 }
 0x10d   :  { %v159_v20 = vpop.f32.mrb[0].mxu0 }
 0x10e   :  { %v160_v21 = vadd.f32 %v159_v20, %v79_v18  ;;  %v161_v22 = vpop.f32.mrb[1].mxu0 }
 0x10f   :  { %v162_v23 = vadd.f32 %v161_v22, %v83_v19 }
 0x110   :  { %170 = vst [vmem:[#allocation2] sm:$0xff] %v160_v21 }
 0x111   :  { %171 = vst [vmem:[#allocation2 + $0x8] sm:$0xff] %v162_v23  ;;  %v165_v50 = vpop.f32.mrb[2].mxu0 }
 0x112   :  { %v166_v51 = vadd.f32 %v165_v50, %v79_v18  ;;  %v167_v52 = vpop.f32.mrb[3].mxu0 }
 0x113   :  { %v168_v53 = vadd.f32 %v167_v52, %v83_v19 }
 0x114   :  { %172 = vst [vmem:[#allocation2 + $0x10] sm:$0xff] %v166_v51 }
 0x115   :  { %173 = vst [vmem:[#allocation2 + $0x18] sm:$0xff] %v168_v53 }
 0x118   :  { %v182_v24 = vld [vmem:[#allocation2] ss:$8 sm:$0x3]  ;;  %v309_v55 = vld [vmem:[#allocation2 + $0x1] ss:$8 sm:$0x3] }
 0x119   :  { %v227_v25 = vrot.slane %v182_v24, %v2705_v15  ;;  %v231_v32 = vrot.slane %v182_v24, %v2710_v17  ;;  %v317_v56 = vrot.slane %v309_v55, %v2705_v15  ;;  %v321_v63 = vrot.slane %v309_v55, %v2710_v17 }
 0x11b   :  { %v272_v26 = vpop.f32.mrb[0].mxu1 }
 0x11c   :  { %v273_v27 = vadd.f32 %v272_v26, %v227_v25  ;;  %v274_v28 = vpop.f32.mrb[1].mxu1 }
 0x11d   :  { %v276_v29 = vpop.f32.mrb[2].mxu1  ;;  %v275_v33 = vadd.f32 %v274_v28, %v231_v32 }
 0x11e   :  { %v2079_v30 = vmul.f32 -1.442695, %v273_v27  ;;  %v277_v31 = vpop.f32.mrb[3].mxu1  ;;  %v397_v29 = vld [vmem:[#allocation2 + $0x2] ss:$8 sm:$0x3] }
 0x11f   :  { %v2080_v40 = vmul.f32 -1.442695, %v275_v33 }
 0x120   :  { %2261 = vpow2.f32 %v2079_v30  ;;  %v405_v30 = vrot.slane %v397_v29, %v2705_v15 }
 0x121   :  { %2263 = vtanh.f32 %v275_v33 }
 0x12a   :  { %v2262_v34 = vpop.eup %2261 }
 0x12b   :  { %v285_v35 = vadd.f32 1.0, %v2262_v34  ;;  %v2264_v36 = vpop.eup %2263 }
 0x12d   :  { %2265 = vrcp.f32 %v285_v35 }
 0x12e   :  { %2267 = vpow2.f32 %v2080_v40 }
 0x137   :  { %v2266_v37 = vpop.eup %2265 }
 0x138   :  { %v293_v38 = vmul.f32 %v2266_v37, %v2264_v36  ;;  %v2268_v41 = vpop.eup %2267  ;;  %v292_v43 = vmul.f32 0.0, %v2266_v37  ;;  %v409_v37 = vrot.slane %v397_v29, %v2710_v17 }
 0x139   :  { %v286_v42 = vadd.f32 1.0, %v2268_v41 }
 0x13a   :  { %295 = vrot.lane.b32.xlu0 %v293_v38, %s2562_s3 }
 0x13b   :  { %2269 = vrcp.f32 %v286_v42 }
 0x145   :  { %v2270_v46 = vpop.eup %2269 }
 0x1ac   :  { %v296_v44 = vpop.permute.xlu0 %295 }
 0x1ad   :  { %v298_v45 = vadd.f32 %v296_v44, %v292_v43 }
 0x1af   :  { %2271 = vtanh.f32 %v298_v45 }
 0x1b9   :  { %v2272_v47 = vpop.eup %2271 }
 0x1ba   :  { %v2722_v48 = vmul.f32 %v2272_v47, %v2270_v46 }
 0x1bc   :  { %v307_v49 = vpack.c.bf16 %v2722_v48, %v2722_v48 }
 0x1be   :  { %311 = vrot.lane.b32.xlu0 %v307_v49, %s2562_s3 }
 0x230   :  { %v312_v54 = vpop.permute.xlu0 %311 }
 0x231   :  { %2081 = vmatmul.mubr.msk.bf16.vlgmr.msra.gmra.mrb[4].mxu0 %vm234_vm1, %v312_v54 }
 0x232   :  { %504 = vmatpush1.bf16.msra.mxu0 %v2658_v5  ;;  %535 = vmatprep.mubr.bf16.mxu0 %v2561_v1 }
 0x233   :  { %505 = vmatprep.subr.bf16.mxu0 %v2665_v7 }
 0x236   :  { %506 = vmatpush1.bf16.msra.mxu0 %v2668_v8 }
 0x237   :  { %507 = vmatprep.subr.bf16.mxu0 %v2672_v9 }
 0x23a   :  { %508 = vmatpush1.bf16.msra.mxu0 %v2678_v10 }
 0x23b   :  { %509 = vmatprep.subr.bf16.mxu0 %v2681_v11 }
 0x23e   :  { %510 = vmatpush1.bf16.msra.mxu0 %v2686_v12 }
 0x23f   :  { %679 = vmatprep.subr.bf16.mxu0 %v2656_v3 }
 0x304   :  { %v361_v57 = vpop.f32.mrb[4].mxu0 }
 0x305   :  { %v362_v58 = vadd.f32 %v361_v57, %v317_v56  ;;  %v363_v59 = vpop.f32.mrb[5].mxu0  ;;  %v485_v56 = vld [vmem:[#allocation2 + $0x3] ss:$8 sm:$0x3] }
 0x306   :  { %v365_v60 = vpop.f32.mrb[6].mxu0  ;;  %v364_v2 = vadd.f32 %v363_v59, %v321_v63  ;;  %v493_v57 = vrot.slane %v485_v56, %v2705_v15 }
 0x307   :  { %v2082_v61 = vmul.f32 -1.442695, %v362_v58  ;;  %v366_v62 = vpop.f32.mrb[7].mxu0 }
 0x308   :  { %v2083_v18 = vmul.f32 -1.442695, %v364_v2 }
 0x309   :  { %2273 = vpow2.f32 %v2082_v61 }
 0x30a   :  { %2275 = vtanh.f32 %v364_v2  ;;  %v497_v2 = vrot.slane %v485_v56, %v2710_v17 }
 0x313   :  { %v2274_v4 = vpop.eup %2273 }
 0x314   :  { %v374_v6 = vadd.f32 1.0, %v2274_v4  ;;  %v2276_v13 = vpop.eup %2275 }
 0x316   :  { %2277 = vrcp.f32 %v374_v6 }
 0x317   :  { %2279 = vpow2.f32 %v2083_v18 }
 0x320   :  { %v2278_v14 = vpop.eup %2277 }
 0x321   :  { %v382_v16 = vmul.f32 %v2278_v14, %v2276_v13  ;;  %v2280_v19 = vpop.eup %2279  ;;  %v381_v21 = vmul.f32 %v2278_v14, %v298_v45 }
 0x322   :  { %v375_v20 = vadd.f32 1.0, %v2280_v19 }
 0x323   :  { %384 = vrot.lane.b32.xlu1 %v382_v16, %s2562_s3 }
 0x324   :  { %2281 = vrcp.f32 %v375_v20 }
 0x32e   :  { %v2282_v24 = vpop.eup %2281 }
 0x395   :  { %v385_v22 = vpop.permute.xlu1 %384 }
 0x396   :  { %v387_v23 = vadd.f32 %v385_v22, %v381_v21 }
 0x398   :  { %2283 = vtanh.f32 %v387_v23 }
 0x3a2   :  { %v2284_v25 = vpop.eup %2283 }
 0x3a3   :  { %v2740_v26 = vmul.f32 %v2284_v25, %v2282_v24 }
 0x3a5   :  { %v395_v27 = vpack.c.bf16 %v2740_v26, %v2740_v26 }
 0x3a7   :  { %399 = vrot.lane.b32.xlu1 %v395_v27, %s2562_s3 }
 0x419   :  { %v400_v28 = vpop.permute.xlu1 %399 }
 0x41a   :  { %2084 = vmatmul.mubr.msk.bf16.vlgmr.msra.gmra.mrb[4].mxu1 %vm234_vm1, %v400_v28 }
 0x41b   :  { %592 = vmatpush1.bf16.msra.mxu1 %v2658_v5  ;;  %623 = vmatprep.mubr.bf16.mxu1 %v2561_v1 }
 0x41c   :  { %593 = vmatprep.subr.bf16.mxu1 %v2665_v7 }
 0x41f   :  { %594 = vmatpush1.bf16.msra.mxu1 %v2668_v8 }
 0x420   :  { %595 = vmatprep.subr.bf16.mxu1 %v2672_v9 }
 0x423   :  { %596 = vmatpush1.bf16.msra.mxu1 %v2678_v10 }
 0x424   :  { %597 = vmatprep.subr.bf16.mxu1 %v2681_v11 }
 0x427   :  { %598 = vmatpush1.bf16.msra.mxu1 %v2686_v12 }
 0x428   :  { %767 = vmatprep.subr.bf16.mxu1 %v2656_v3 }
 0x4ed   :  { %v449_v31 = vpop.f32.mrb[4].mxu1 }
 0x4ee   :  { %v450_v32 = vadd.f32 %v449_v31, %v405_v30  ;;  %v451_v33 = vpop.f32.mrb[5].mxu1  ;;  %v573_v31 = vld [vmem:[#allocation2 + $0x4] ss:$8 sm:$0x3] }
 0x4ef   :  { %v453_v34 = vpop.f32.mrb[6].mxu1  ;;  %v452_v38 = vadd.f32 %v451_v33, %v409_v37 }
 0x4f0   :  { %v2085_v35 = vmul.f32 -1.442695, %v450_v32  ;;  %v454_v36 = vpop.f32.mrb[7].mxu1  ;;  %v581_v32 = vrot.slane %v573_v31, %v2705_v15 }
 0x4f1   :  { %v2086_v44 = vmul.f32 -1.442695, %v452_v38 }
 0x4f2   :  { %2285 = vpow2.f32 %v2085_v35 }
 0x4f3   :  { %2287 = vtanh.f32 %v452_v38 }
 0x4fc   :  { %v2286_v39 = vpop.eup %2285 }
 0x4fd   :  { %v462_v40 = vadd.f32 1.0, %v2286_v39  ;;  %v2288_v41 = vpop.eup %2287  ;;  %v585_v39 = vrot.slane %v573_v31, %v2710_v17 }
 0x4ff   :  { %2289 = vrcp.f32 %v462_v40 }
 0x500   :  { %2291 = vpow2.f32 %v2086_v44 }
 0x509   :  { %v2290_v42 = vpop.eup %2289 }
 0x50a   :  { %v470_v43 = vmul.f32 %v2290_v42, %v2288_v41  ;;  %v2292_v45 = vpop.eup %2291  ;;  %v469_v47 = vmul.f32 %v2290_v42, %v387_v23 }
 0x50b   :  { %v463_v46 = vadd.f32 1.0, %v2292_v45 }
 0x50c   :  { %472 = vrot.lane.b32.xlu0 %v470_v43, %s2562_s3 }
 0x50d   :  { %2293 = vrcp.f32 %v463_v46 }
 0x517   :  { %v2294_v51 = vpop.eup %2293 }
 0x57e   :  { %v473_v49 = vpop.permute.xlu0 %472 }
 0x57f   :  { %v475_v50 = vadd.f32 %v473_v49, %v469_v47 }
 0x581   :  { %2295 = vtanh.f32 %v475_v50 }
 0x58b   :  { %v2296_v52 = vpop.eup %2295 }
 0x58c   :  { %v2758_v53 = vmul.f32 %v2296_v52, %v2294_v51 }
 0x58e   :  { %v483_v54 = vpack.c.bf16 %v2758_v53, %v2758_v53 }
 0x590   :  { %487 = vrot.lane.b32.xlu1 %v483_v54, %s2562_s3 }
 0x602   :  { %v488_v55 = vpop.permute.xlu1 %487 }
 0x603   :  { %2087 = vmatmul.mubr.msk.bf16.vlgmr.msra.gmra.mrb[8].mxu0 %vm234_vm1, %v488_v55 }
 0x604   :  { %680 = vmatpush1.bf16.msra.mxu0 %v2658_v5  ;;  %711 = vmatprep.mubr.bf16.mxu0 %v2561_v1 }
 0x605   :  { %681 = vmatprep.subr.bf16.mxu0 %v2665_v7 }
 0x608   :  { %682 = vmatpush1.bf16.msra.mxu0 %v2668_v8 }
 0x609   :  { %683 = vmatprep.subr.bf16.mxu0 %v2672_v9 }
 0x60c   :  { %684 = vmatpush1.bf16.msra.mxu0 %v2678_v10 }
 0x60d   :  { %685 = vmatprep.subr.bf16.mxu0 %v2681_v11 }
 0x610   :  { %686 = vmatpush1.bf16.msra.mxu0 %v2686_v12 }
 0x611   :  { %855 = vmatprep.subr.bf16.mxu0 %v2656_v3 }
 0x6d6   :  { %v537_v58 = vpop.f32.mrb[8].mxu0 }
 0x6d7   :  { %v538_v59 = vadd.f32 %v537_v58, %v493_v57  ;;  %v539_v60 = vpop.f32.mrb[9].mxu0 }
 0x6d8   :  { %v541_v61 = vpop.f32.mrb[10].mxu0  ;;  %v540_v4 = vadd.f32 %v539_v60, %v497_v2 }
 0x6d9   :  { %v2088_v62 = vmul.f32 -1.442695, %v538_v59  ;;  %v542_v63 = vpop.f32.mrb[11].mxu0  ;;  %v661_v59 = vld [vmem:[#allocation2 + $0x5] ss:$8 sm:$0x3] }
 0x6da   :  { %v2089_v19 = vmul.f32 -1.442695, %v540_v4  ;;  %v669_v60 = vrot.slane %v661_v59, %v2705_v15 }
 0x6db   :  { %2297 = vpow2.f32 %v2088_v62 }
 0x6dc   :  { %2299 = vtanh.f32 %v540_v4 }
 0x6e5   :  { %v2298_v6 = vpop.eup %2297 }
 0x6e6   :  { %v550_v13 = vadd.f32 1.0, %v2298_v6  ;;  %v2300_v14 = vpop.eup %2299 }
 0x6e8   :  { %2301 = vrcp.f32 %v550_v13  ;;  %v673_v13 = vrot.slane %v661_v59, %v2710_v17 }
 0x6e9   :  { %2303 = vpow2.f32 %v2089_v19 }
 0x6f2   :  { %v2302_v16 = vpop.eup %2301 }
 0x6f3   :  { %v558_v18 = vmul.f32 %v2302_v16, %v2300_v14  ;;  %v2304_v20 = vpop.eup %2303  ;;  %v557_v22 = vmul.f32 %v2302_v16, %v475_v50 }
 0x6f4   :  { %v551_v21 = vadd.f32 1.0, %v2304_v20 }
 0x6f5   :  { %560 = vrot.lane.b32.xlu0 %v558_v18, %s2562_s3 }
 0x6f6   :  { %2305 = vrcp.f32 %v551_v21 }
 0x700   :  { %v2306_v25 = vpop.eup %2305 }
 0x767   :  { %v561_v23 = vpop.permute.xlu0 %560 }
 0x768   :  { %v563_v24 = vadd.f32 %v561_v23, %v557_v22 }
 0x76a   :  { %2307 = vtanh.f32 %v563_v24 }
 0x774   :  { %v2308_v27 = vpop.eup %2307 }
 0x775   :  { %v2776_v28 = vmul.f32 %v2308_v27, %v2306_v25 }
 0x777   :  { %v571_v29 = vpack.c.bf16 %v2776_v28, %v2776_v28 }
 0x779   :  { %575 = vrot.lane.b32.xlu1 %v571_v29, %s2562_s3 }
 0x7eb   :  { %v576_v30 = vpop.permute.xlu1 %575 }
 0x7ec   :  { %2090 = vmatmul.mubr.msk.bf16.vlgmr.msra.gmra.mrb[8].mxu1 %vm234_vm1, %v576_v30 }
 0x7ed   :  { %768 = vmatpush1.bf16.msra.mxu1 %v2658_v5  ;;  %799 = vmatprep.mubr.bf16.mxu1 %v2561_v1 }
 0x7ee   :  { %769 = vmatprep.subr.bf16.mxu1 %v2665_v7 }
 0x7f1   :  { %770 = vmatpush1.bf16.msra.mxu1 %v2668_v8 }
 0x7f2   :  { %771 = vmatprep.subr.bf16.mxu1 %v2672_v9 }
 0x7f5   :  { %772 = vmatpush1.bf16.msra.mxu1 %v2678_v10 }
 0x7f6   :  { %773 = vmatprep.subr.bf16.mxu1 %v2681_v11 }
 0x7f9   :  { %774 = vmatpush1.bf16.msra.mxu1 %v2686_v12 }
 0x7fa   :  { %943 = vmatprep.subr.bf16.mxu1 %v2656_v3 }
 0x8bf   :  { %v625_v33 = vpop.f32.mrb[8].mxu1 }
 0x8c0   :  { %v626_v34 = vadd.f32 %v625_v33, %v581_v32  ;;  %v627_v35 = vpop.f32.mrb[9].mxu1 }
 0x8c1   :  { %v629_v36 = vpop.f32.mrb[10].mxu1  ;;  %v628_v40 = vadd.f32 %v627_v35, %v585_v39  ;;  %v749_v35 = vld [vmem:[#allocation2 + $0x6] ss:$8 sm:$0x3] }
 0x8c2   :  { %v2091_v37 = vmul.f32 -1.442695, %v626_v34  ;;  %v630_v38 = vpop.f32.mrb[11].mxu1  ;;  %v757_v36 = vrot.slane %v749_v35, %v2705_v15 }
 0x8c3   :  { %v2092_v46 = vmul.f32 -1.442695, %v628_v40 }
 0x8c4   :  { %2309 = vpow2.f32 %v2091_v37 }
 0x8c5   :  { %2311 = vtanh.f32 %v628_v40 }
 0x8ce   :  { %v2310_v41 = vpop.eup %2309 }
 0x8cf   :  { %v638_v42 = vadd.f32 1.0, %v2310_v41  ;;  %v2312_v43 = vpop.eup %2311 }
 0x8d1   :  { %2313 = vrcp.f32 %v638_v42 }
 0x8d2   :  { %2315 = vpow2.f32 %v2092_v46 }
 0x8db   :  { %v2314_v44 = vpop.eup %2313 }
 0x8dc   :  { %v646_v45 = vmul.f32 %v2314_v44, %v2312_v43  ;;  %v2316_v47 = vpop.eup %2315  ;;  %v645_v50 = vmul.f32 %v2314_v44, %v563_v24  ;;  %v761_v43 = vrot.slane %v749_v35, %v2710_v17 }
 0x8dd   :  { %v639_v49 = vadd.f32 1.0, %v2316_v47 }
 0x8de   :  { %648 = vrot.lane.b32.xlu0 %v646_v45, %s2562_s3 }
 0x8df   :  { %2317 = vrcp.f32 %v639_v49 }
 0x8e9   :  { %v2318_v54 = vpop.eup %2317 }
 0x950   :  { %v649_v51 = vpop.permute.xlu0 %648 }
 0x951   :  { %v651_v52 = vadd.f32 %v649_v51, %v645_v50 }
 0x953   :  { %2319 = vtanh.f32 %v651_v52 }
 0x95d   :  { %v2320_v55 = vpop.eup %2319 }
 0x95e   :  { %v2794_v56 = vmul.f32 %v2320_v55, %v2318_v54 }
 0x960   :  { %v659_v57 = vpack.c.bf16 %v2794_v56, %v2794_v56 }
 0x962   :  { %663 = vrot.lane.b32.xlu1 %v659_v57, %s2562_s3 }
 0x9d4   :  { %v664_v58 = vpop.permute.xlu1 %663 }
 0x9d5   :  { %2093 = vmatmul.mubr.msk.bf16.vlgmr.msra.gmra.mrb[12].mxu0 %vm234_vm1, %v664_v58 }
 0x9d6   :  { %856 = vmatpush1.bf16.msra.mxu0 %v2658_v5  ;;  %887 = vmatprep.mubr.bf16.mxu0 %v2561_v1 }
 0x9d7   :  { %857 = vmatprep.subr.bf16.mxu0 %v2665_v7 }
 0x9da   :  { %858 = vmatpush1.bf16.msra.mxu0 %v2668_v8 }
 0x9db   :  { %859 = vmatprep.subr.bf16.mxu0 %v2672_v9 }
 0x9de   :  { %860 = vmatpush1.bf16.msra.mxu0 %v2678_v10 }
 0x9df   :  { %861 = vmatprep.subr.bf16.mxu0 %v2681_v11 }
 0x9e2   :  { %862 = vmatpush1.bf16.msra.mxu0 %v2686_v12 }
 0x9e3   :  { %1031 = vmatprep.subr.bf16.mxu0 %v2656_v3 }
 0xaa8   :  { %v713_v61 = vpop.f32.mrb[12].mxu0 }
 0xaa9   :  { %v714_v62 = vadd.f32 %v713_v61, %v669_v60  ;;  %v715_v63 = vpop.f32.mrb[13].mxu0 }
 0xaaa   :  { %v717_v2 = vpop.f32.mrb[14].mxu0  ;;  %v716_v14 = vadd.f32 %v715_v63, %v673_v13 }
 0xaab   :  { %v2094_v4 = vmul.f32 -1.442695, %v714_v62  ;;  %v718_v6 = vpop.f32.mrb[15].mxu0  ;;  %v837_v2 = vld [vmem:[#allocation2 + $0x7] ss:$8 sm:$0x3] }
 0xaac   :  { %v2095_v22 = vmul.f32 -1.442695, %v716_v14 }
 0xaad   :  { %2321 = vpow2.f32 %v2094_v4  ;;  %v845_v4 = vrot.slane %v837_v2, %v2705_v15 }
 0xaae   :  { %2323 = vtanh.f32 %v716_v14 }
 0xab7   :  { %v2322_v16 = vpop.eup %2321 }
 0xab8   :  { %v726_v18 = vadd.f32 1.0, %v2322_v16  ;;  %v2324_v19 = vpop.eup %2323 }
 0xaba   :  { %2325 = vrcp.f32 %v726_v18 }
 0xabb   :  { %2327 = vpow2.f32 %v2095_v22 }
 0xac4   :  { %v2326_v20 = vpop.eup %2325 }
 0xac5   :  { %v734_v21 = vmul.f32 %v2326_v20, %v2324_v19  ;;  %v2328_v23 = vpop.eup %2327  ;;  %v733_v25 = vmul.f32 %v2326_v20, %v651_v52  ;;  %v849_v20 = vrot.slane %v837_v2, %v2710_v17 }
 0xac6   :  { %v727_v24 = vadd.f32 1.0, %v2328_v23 }
 0xac7   :  { %736 = vrot.lane.b32.xlu0 %v734_v21, %s2562_s3 }
 0xac8   :  { %2329 = vrcp.f32 %v727_v24 }
 0xad2   :  { %v2330_v30 = vpop.eup %2329 }
 0xb39   :  { %v737_v27 = vpop.permute.xlu0 %736 }
 0xb3a   :  { %v739_v29 = vadd.f32 %v737_v27, %v733_v25 }
 0xb3c   :  { %2331 = vtanh.f32 %v739_v29 }
 0xb46   :  { %v2332_v31 = vpop.eup %2331 }
 0xb47   :  { %v2812_v32 = vmul.f32 %v2332_v31, %v2330_v30 }
 0xb49   :  { %v747_v33 = vpack.c.bf16 %v2812_v32, %v2812_v32 }
 0xb4b   :  { %751 = vrot.lane.b32.xlu1 %v747_v33, %s2562_s3 }
 0xbbd   :  { %v752_v34 = vpop.permute.xlu1 %751 }
 0xbbe   :  { %2096 = vmatmul.mubr.msk.bf16.vlgmr.msra.gmra.mrb[12].mxu1 %vm234_vm1, %v752_v34 }
 0xbbf   :  { %944 = vmatpush1.bf16.msra.mxu1 %v2658_v5  ;;  %975 = vmatprep.mubr.bf16.mxu1 %v2561_v1 }
 0xbc0   :  { %945 = vmatprep.subr.bf16.mxu1 %v2665_v7 }
 0xbc3   :  { %946 = vmatpush1.bf16.msra.mxu1 %v2668_v8 }
 0xbc4   :  { %947 = vmatprep.subr.bf16.mxu1 %v2672_v9 }
 0xbc7   :  { %948 = vmatpush1.bf16.msra.mxu1 %v2678_v10 }
 0xbc8   :  { %949 = vmatprep.subr.bf16.mxu1 %v2681_v11 }
 0xbcb   :  { %950 = vmatpush1.bf16.msra.mxu1 %v2686_v12 }
 0xbcc   :  { %1119 = vmatprep.subr.bf16.mxu1 %v2656_v3 }
 0xc91   :  { %v801_v37 = vpop.f32.mrb[12].mxu1 }
 0xc92   :  { %v802_v38 = vadd.f32 %v801_v37, %v757_v36  ;;  %v803_v39 = vpop.f32.mrb[13].mxu1 }
 0xc93   :  { %v805_v40 = vpop.f32.mrb[14].mxu1  ;;  %v804_v44 = vadd.f32 %v803_v39, %v761_v43 }
 0xc94   :  { %v2097_v41 = vmul.f32 -1.442695, %v802_v38  ;;  %v806_v42 = vpop.f32.mrb[15].mxu1 }
 0xc95   :  { %v2098_v51 = vmul.f32 -1.442695, %v804_v44 }
 0xc96   :  { %2333 = vpow2.f32 %v2097_v41  ;;  %v925_v41 = vld [vmem:[#allocation2 + $0x10] ss:$8 sm:$0x3] }
 0xc97   :  { %2335 = vtanh.f32 %v804_v44  ;;  %v933_v42 = vrot.slane %v925_v41, %v2705_v15 }
 0xca0   :  { %v2334_v45 = vpop.eup %2333 }
 0xca1   :  { %v814_v46 = vadd.f32 1.0, %v2334_v45  ;;  %v2336_v47 = vpop.eup %2335 }
 0xca3   :  { %2337 = vrcp.f32 %v814_v46 }
 0xca4   :  { %2339 = vpow2.f32 %v2098_v51 }
 0xcad   :  { %v2338_v49 = vpop.eup %2337 }
 0xcae   :  { %v822_v50 = vmul.f32 %v2338_v49, %v2336_v47  ;;  %v2340_v52 = vpop.eup %2339  ;;  %v821_v55 = vmul.f32 %v2338_v49, %v739_v29 }
 0xcaf   :  { %v815_v54 = vadd.f32 1.0, %v2340_v52 }
 0xcb0   :  { %824 = vrot.lane.b32.xlu0 %v822_v50, %s2562_s3  ;;  %v937_v50 = vrot.slane %v925_v41, %v2710_v17 }
 0xcb1   :  { %2341 = vrcp.f32 %v815_v54 }
 0xcbb   :  { %v2342_v59 = vpop.eup %2341 }
 0xd22   :  { %v825_v57 = vpop.permute.xlu0 %824 }
 0xd23   :  { %v827_v58 = vadd.f32 %v825_v57, %v821_v55 }
 0xd25   :  { %2343 = vtanh.f32 %v827_v58 }
 0xd2f   :  { %v2344_v60 = vpop.eup %2343 }
 0xd30   :  { %v2830_v61 = vmul.f32 %v2344_v60, %v2342_v59 }
 0xd32   :  { %v835_v62 = vpack.c.bf16 %v2830_v61, %v2830_v61 }
 0xd34   :  { %839 = vrot.lane.b32.xlu1 %v835_v62, %s2562_s3 }
 0xda6   :  { %v840_v63 = vpop.permute.xlu1 %839 }
 0xda7   :  { %2099 = vmatmul.mubr.msk.bf16.vlgmr.msra.gmra.mrb[16].mxu0 %vm234_vm1, %v840_v63 }
 0xda8   :  { %1032 = vmatpush1.bf16.msra.mxu0 %v2658_v5  ;;  %1063 = vmatprep.mubr.bf16.mxu0 %v2561_v1 }
 0xda9   :  { %1033 = vmatprep.subr.bf16.mxu0 %v2665_v7 }
 0xdac   :  { %1034 = vmatpush1.bf16.msra.mxu0 %v2668_v8 }
 0xdad   :  { %1035 = vmatprep.subr.bf16.mxu0 %v2672_v9 }
 0xdb0   :  { %1036 = vmatpush1.bf16.msra.mxu0 %v2678_v10 }
 0xdb1   :  { %1037 = vmatprep.subr.bf16.mxu0 %v2681_v11 }
 0xdb4   :  { %1038 = vmatpush1.bf16.msra.mxu0 %v2686_v12 }
 0xdb5   :  { %1207 = vmatprep.subr.bf16.mxu0 %v2656_v3 }
 0xe7a   :  { %v889_v6 = vpop.f32.mrb[16].mxu0 }
 0xe7b   :  { %v890_v13 = vadd.f32 %v889_v6, %v845_v4  ;;  %v891_v14 = vpop.f32.mrb[17].mxu0 }
 0xe7c   :  { %v893_v16 = vpop.f32.mrb[18].mxu0  ;;  %v892_v21 = vadd.f32 %v891_v14, %v849_v20 }
 0xe7d   :  { %v2100_v18 = vmul.f32 -1.442695, %v890_v13  ;;  %v894_v19 = vpop.f32.mrb[19].mxu0 }
 0xe7e   :  { %v2101_v29 = vmul.f32 -1.442695, %v892_v21  ;;  %v1013_v19 = vld [vmem:[#allocation2 + $0x11] ss:$8 sm:$0x3] }
 0xe7f   :  { %2345 = vpow2.f32 %v2100_v18  ;;  %v1021_v20 = vrot.slane %v1013_v19, %v2705_v15 }
 0xe80   :  { %2347 = vtanh.f32 %v892_v21 }
 0xe89   :  { %v2346_v22 = vpop.eup %2345 }
 0xe8a   :  { %v902_v23 = vadd.f32 1.0, %v2346_v22  ;;  %v2348_v24 = vpop.eup %2347 }
 0xe8c   :  { %2349 = vrcp.f32 %v902_v23 }
 0xe8d   :  { %2351 = vpow2.f32 %v2101_v29  ;;  %v1025_v29 = vrot.slane %v1013_v19, %v2710_v17 }
 0xe96   :  { %v2350_v25 = vpop.eup %2349 }
 0xe97   :  { %v910_v27 = vmul.f32 %v2350_v25, %v2348_v24  ;;  %v2352_v30 = vpop.eup %2351  ;;  %v909_v33 = vmul.f32 %v2350_v25, %v827_v58 }
 0xe98   :  { %v903_v31 = vadd.f32 1.0, %v2352_v30 }
 0xe99   :  { %912 = vrot.lane.b32.xlu0 %v910_v27, %s2562_s3 }
 0xe9a   :  { %2353 = vrcp.f32 %v903_v31 }
 0xea4   :  { %v2354_v36 = vpop.eup %2353 }
 0xf0b   :  { %v913_v34 = vpop.permute.xlu0 %912 }
 0xf0c   :  { %v915_v35 = vadd.f32 %v913_v34, %v909_v33 }
 0xf0e   :  { %2355 = vtanh.f32 %v915_v35 }
 0xf18   :  { %v2356_v37 = vpop.eup %2355 }
 0xf19   :  { %v2848_v38 = vmul.f32 %v2356_v37, %v2354_v36 }
 0xf1b   :  { %v923_v39 = vpack.c.bf16 %v2848_v38, %v2848_v38 }
 0xf1d   :  { %927 = vrot.lane.b32.xlu1 %v923_v39, %s2562_s3 }
 0xf8f   :  { %v928_v40 = vpop.permute.xlu1 %927 }
 0xf90   :  { %2102 = vmatmul.mubr.msk.bf16.vlgmr.msra.gmra.mrb[16].mxu1 %vm234_vm1, %v928_v40 }
 0xf91   :  { %1120 = vmatpush1.bf16.msra.mxu1 %v2658_v5  ;;  %1151 = vmatprep.mubr.bf16.mxu1 %v2561_v1 }
 0xf92   :  { %1121 = vmatprep.subr.bf16.mxu1 %v2665_v7 }
 0xf95   :  { %1122 = vmatpush1.bf16.msra.mxu1 %v2668_v8 }
 0xf96   :  { %1123 = vmatprep.subr.bf16.mxu1 %v2672_v9 }
 0xf99   :  { %1124 = vmatpush1.bf16.msra.mxu1 %v2678_v10 }
 0xf9a   :  { %1125 = vmatprep.subr.bf16.mxu1 %v2681_v11 }
 0xf9d   :  { %1126 = vmatpush1.bf16.msra.mxu1 %v2686_v12 }
 0xf9e   :  { %1295 = vmatprep.subr.bf16.mxu1 %v2656_v3 }
0x1063   :  { %v977_v43 = vpop.f32.mrb[16].mxu1 }
0x1064   :  { %v978_v44 = vadd.f32 %v977_v43, %v933_v42  ;;  %v979_v45 = vpop.f32.mrb[17].mxu1 }
0x1065   :  { %v981_v46 = vpop.f32.mrb[18].mxu1  ;;  %v980_v51 = vadd.f32 %v979_v45, %v937_v50  ;;  %v1101_v50 = vld [vmem:[#allocation2 + $0x12] ss:$8 sm:$0x3] }
0x1066   :  { %v2103_v47 = vmul.f32 -1.442695, %v978_v44  ;;  %v982_v49 = vpop.f32.mrb[19].mxu1 }
0x1067   :  { %v2104_v59 = vmul.f32 -1.442695, %v980_v51 }
0x1068   :  { %2357 = vpow2.f32 %v2103_v47 }
0x1069   :  { %2359 = vtanh.f32 %v980_v51  ;;  %v1109_v51 = vrot.slane %v1101_v50, %v2705_v15 }
0x1072   :  { %v2358_v52 = vpop.eup %2357 }
0x1073   :  { %v990_v54 = vadd.f32 1.0, %v2358_v52  ;;  %v2360_v55 = vpop.eup %2359 }
0x1075   :  { %2361 = vrcp.f32 %v990_v54 }
0x1076   :  { %2363 = vpow2.f32 %v2104_v59 }
0x107f   :  { %v2362_v57 = vpop.eup %2361 }
0x1080   :  { %v998_v58 = vmul.f32 %v2362_v57, %v2360_v55  ;;  %v2364_v60 = vpop.eup %2363  ;;  %v997_v63 = vmul.f32 %v2362_v57, %v915_v35 }
0x1081   :  { %v991_v62 = vadd.f32 1.0, %v2364_v60 }
0x1082   :  { %1000 = vrot.lane.b32.xlu0 %v998_v58, %s2562_s3 }
0x1083   :  { %2365 = vrcp.f32 %v991_v62 }
0x108d   :  { %v2366_v6 = vpop.eup %2365 }
0x10f4   :  { %v1001_v2 = vpop.permute.xlu0 %1000 }
0x10f5   :  { %v1003_v4 = vadd.f32 %v1001_v2, %v997_v63 }
0x10f7   :  { %2367 = vtanh.f32 %v1003_v4 }
0x1101   :  { %v2368_v13 = vpop.eup %2367 }
0x1102   :  { %v2866_v14 = vmul.f32 %v2368_v13, %v2366_v6 }
0x1104   :  { %v1011_v16 = vpack.c.bf16 %v2866_v14, %v2866_v14 }
0x1106   :  { %1015 = vrot.lane.b32.xlu1 %v1011_v16, %s2562_s3 }
0x1178   :  { %v1016_v18 = vpop.permute.xlu1 %1015 }
0x1179   :  { %2105 = vmatmul.mubr.msk.bf16.vlgmr.msra.gmra.mrb[20].mxu0 %vm234_vm1, %v1016_v18 }
0x117a   :  { %1208 = vmatpush1.bf16.msra.mxu0 %v2658_v5  ;;  %1239 = vmatprep.mubr.bf16.mxu0 %v2561_v1 }
0x117b   :  { %1209 = vmatprep.subr.bf16.mxu0 %v2665_v7 }
0x117e   :  { %1210 = vmatpush1.bf16.msra.mxu0 %v2668_v8 }
0x117f   :  { %1211 = vmatprep.subr.bf16.mxu0 %v2672_v9 }
0x1182   :  { %1212 = vmatpush1.bf16.msra.mxu0 %v2678_v10 }
0x1183   :  { %1213 = vmatprep.subr.bf16.mxu0 %v2681_v11 }
0x1186   :  { %1214 = vmatpush1.bf16.msra.mxu0 %v2686_v12 }
0x1187   :  { %1383 = vmatprep.subr.bf16.mxu0 %v2656_v3 }
0x124c   :  { %v1065_v21 = vpop.f32.mrb[20].mxu0 }
0x124d   :  { %v1066_v22 = vadd.f32 %v1065_v21, %v1021_v20  ;;  %v1067_v23 = vpop.f32.mrb[21].mxu0  ;;  %v2908_v20 = vld [vmem:[#allocation7] ss:$8 sps:$4 sm:$0xff]   ;;  %v2912_v21 = vld [vmem:[#allocation7 + $0x14] ss:$8 sps:$4 sm:$0xff]  }
0x124e   :  { %v1069_v24 = vpop.f32.mrb[22].mxu0  ;;  %v1068_v30 = vadd.f32 %v1067_v23, %v1025_v29  ;;  %v2918_v23 = vld [vmem:[#allocation7 + $0x24] ss:$8 sps:$4 sm:$0xff]  }
0x124f   :  { %v2106_v25 = vmul.f32 -1.442695, %v1066_v22  ;;  %v1070_v27 = vpop.f32.mrb[23].mxu0  ;;  %v2915_v22 = vld [vmem:[#allocation7 + $0x10] ss:$8 sps:$4 sm:$0xff]  }
0x1250   :  { %v2107_v37 = vmul.f32 -1.442695, %v1068_v30  ;;  %v2921_v24 = vld [vmem:[#allocation7 + $0x20] ss:$8 sps:$4 sm:$0xff]   ;;  %v2927_v27 = vld [vmem:[#allocation7 + $0x30] ss:$8 sps:$4 sm:$0xff]  }
0x1251   :  { %2369 = vpow2.f32 %v2106_v25  ;;  %v2924_v25 = vld [vmem:[#allocation7 + $0x34] ss:$8 sps:$4 sm:$0xff]   ;;  %v2460_v29 = vld [vmem:[#allocation7 + $0x4] ss:$8 sps:$4 sm:$0xff]  }
0x1252   :  { %2371 = vtanh.f32 %v1068_v30  ;;  %v1189_v30 = vld [vmem:[#allocation2 + $0x13] ss:$8 sm:$0x3] }
0x125b   :  { %v2370_v31 = vpop.eup %2369 }
0x125c   :  { %v1078_v33 = vadd.f32 1.0, %v2370_v31  ;;  %v2372_v34 = vpop.eup %2371  ;;  %v1197_v31 = vrot.slane %v1189_v30, %v2705_v15 }
0x125e   :  { %2373 = vrcp.f32 %v1078_v33 }
0x125f   :  { %2375 = vpow2.f32 %v2107_v37 }
0x1268   :  { %v2374_v35 = vpop.eup %2373 }
0x1269   :  { %v1086_v36 = vmul.f32 %v2374_v35, %v2372_v34  ;;  %v2376_v39 = vpop.eup %2375  ;;  %v1085_v41 = vmul.f32 %v2374_v35, %v1003_v4 }
0x126a   :  { %v1079_v40 = vadd.f32 1.0, %v2376_v39 }
0x126b   :  { %1088 = vrot.lane.b32.xlu0 %v1086_v36, %s2562_s3 }
0x126c   :  { %2377 = vrcp.f32 %v1079_v40  ;;  %v1201_v40 = vrot.slane %v1189_v30, %v2710_v17 }
0x1276   :  { %v2378_v44 = vpop.eup %2377 }
0x12dd   :  { %v1089_v42 = vpop.permute.xlu0 %1088 }
0x12de   :  { %v1091_v43 = vadd.f32 %v1089_v42, %v1085_v41 }
0x12e0   :  { %2379 = vtanh.f32 %v1091_v43 }
0x12ea   :  { %v2380_v45 = vpop.eup %2379 }
0x12eb   :  { %v2884_v46 = vmul.f32 %v2380_v45, %v2378_v44 }
0x12ed   :  { %v1099_v47 = vpack.c.bf16 %v2884_v46, %v2884_v46 }
0x12ef   :  { %1103 = vrot.lane.b32.xlu1 %v1099_v47, %s2562_s3 }
0x1361   :  { %v1104_v49 = vpop.permute.xlu1 %1103 }
0x1362   :  { %2108 = vmatmul.mubr.msk.bf16.vlgmr.msra.gmra.mrb[20].mxu1 %vm234_vm1, %v1104_v49 }
0x1363   :  { %1296 = vmatpush1.bf16.msra.mxu1 %v2658_v5  ;;  %1327 = vmatprep.mubr.bf16.mxu1 %v2561_v1 }
0x1364   :  { %1297 = vmatprep.subr.bf16.mxu1 %v2665_v7 }
0x1367   :  { %1298 = vmatpush1.bf16.msra.mxu1 %v2668_v8  ;;  %v1113_v8 = vrot.slane %v1101_v50, %v2710_v17 }
0x1368   :  { %1299 = vmatprep.subr.bf16.mxu1 %v2672_v9 }
0x136b   :  { %1300 = vmatpush1.bf16.msra.mxu1 %v2678_v10 }
0x136c   :  { %1301 = vmatprep.subr.bf16.mxu1 %v2681_v11 }
0x136f   :  { %1302 = vmatpush1.bf16.msra.mxu1 %v2686_v12 }
0x1370   :  { %1471 = vmatprep.subr.bf16.mxu1 %v2656_v3 }
0x1435   :  { %v1153_v5 = vpop.f32.mrb[20].mxu1 }
0x1436   :  { %v1154_v52 = vadd.f32 %v1153_v5, %v1109_v51  ;;  %v1155_v54 = vpop.f32.mrb[21].mxu1 }
0x1437   :  { %v1157_v55 = vpop.f32.mrb[22].mxu1  ;;  %v1156_v9 = vadd.f32 %v1155_v54, %v1113_v8 }
0x1438   :  { %v2109_v7 = vmul.f32 -1.442695, %v1154_v52  ;;  %v1158_v57 = vpop.f32.mrb[23].mxu1 }
0x1439   :  { %v2110_v59 = vmul.f32 -1.442695, %v1156_v9 }
0x143a   :  { %2381 = vpow2.f32 %v2109_v7 }
0x143b   :  { %2383 = vtanh.f32 %v1156_v9 }
0x1444   :  { %v2382_v10 = vpop.eup %2381 }
0x1445   :  { %v1166_v58 = vadd.f32 1.0, %v2382_v10  ;;  %v2384_v11 = vpop.eup %2383  ;;  %v1277_v10 = vld [vmem:[#allocation2 + $0x14] ss:$8 sm:$0x3] }
0x1447   :  { %2385 = vrcp.f32 %v1166_v58  ;;  %v1285_v58 = vrot.slane %v1277_v10, %v2705_v15 }
0x1448   :  { %2387 = vpow2.f32 %v2110_v59 }
0x1451   :  { %v2386_v12 = vpop.eup %2385 }
0x1452   :  { %v1174_v3 = vmul.f32 %v2386_v12, %v2384_v11  ;;  %v2388_v60 = vpop.eup %2387  ;;  %v1173_v63 = vmul.f32 %v2386_v12, %v1091_v43 }
0x1453   :  { %v1167_v62 = vadd.f32 1.0, %v2388_v60 }
0x1454   :  { %1176 = vrot.lane.b32.xlu0 %v1174_v3, %s2562_s3 }
0x1455   :  { %2389 = vrcp.f32 %v1167_v62 }
0x145f   :  { %v2390_v6 = vpop.eup %2389 }
0x14c6   :  { %v1177_v2 = vpop.permute.xlu0 %1176 }
0x14c7   :  { %v1179_v4 = vadd.f32 %v1177_v2, %v1173_v63  ;;  %v1289_v63 = vrot.slane %v1277_v10, %v2710_v17 }
0x14c9   :  { %2391 = vtanh.f32 %v1179_v4 }
0x14d3   :  { %v2392_v13 = vpop.eup %2391 }
0x14d4   :  { %v2902_v16 = vmul.f32 %v2392_v13, %v2390_v6 }
0x14d6   :  { %v1187_v18 = vpack.c.bf16 %v2902_v16, %v2902_v16 }
0x14d8   :  { %1191 = vrot.lane.b32.xlu1 %v1187_v18, %s2562_s3 }
0x154a   :  { %v1192_v19 = vpop.permute.xlu1 %1191 }
0x154b   :  { %2111 = vmatmul.mubr.msk.bf16.vlgmr.msra.gmra.mrb[24].mxu0 %vm234_vm1, %v1192_v19 }
0x154c   :  { %1384 = vmatpush1.bf16.msra.mxu0 %v2908_v20  ;;  %1415 = vmatprep.mubr.bf16.mxu0 %v2561_v1 }
0x154d   :  { %1385 = vmatprep.subr.bf16.mxu0 %v2912_v21 }
0x1550   :  { %1386 = vmatpush1.bf16.msra.mxu0 %v2915_v22 }
0x1551   :  { %1387 = vmatprep.subr.bf16.mxu0 %v2918_v23 }
0x1554   :  { %1388 = vmatpush1.bf16.msra.mxu0 %v2921_v24 }
0x1555   :  { %1389 = vmatprep.subr.bf16.mxu0 %v2924_v25 }
0x1558   :  { %1390 = vmatpush1.bf16.msra.mxu0 %v2927_v27 }
0x1559   :  { %1559 = vmatprep.subr.bf16.mxu0 %v2460_v29 }
0x161e   :  { %v1241_v33 = vpop.f32.mrb[24].mxu0 }
0x161f   :  { %v1242_v34 = vadd.f32 %v1241_v33, %v1197_v31  ;;  %v1243_v35 = vpop.f32.mrb[25].mxu0 }
0x1620   :  { %v1245_v36 = vpop.f32.mrb[26].mxu0  ;;  %v1244_v41 = vadd.f32 %v1243_v35, %v1201_v40 }
0x1621   :  { %v2112_v37 = vmul.f32 -1.442695, %v1242_v34  ;;  %v1246_v39 = vpop.f32.mrb[27].mxu0 }
0x1622   :  { %v2113_v49 = vmul.f32 -1.442695, %v1244_v41 }
0x1623   :  { %2393 = vpow2.f32 %v2112_v37 }
0x1624   :  { %2395 = vtanh.f32 %v1244_v41 }
0x162d   :  { %v2394_v42 = vpop.eup %2393 }
0x162e   :  { %v1254_v43 = vadd.f32 1.0, %v2394_v42  ;;  %v2396_v44 = vpop.eup %2395  ;;  %v1365_v42 = vld [vmem:[#allocation2 + $0x15] ss:$8 sm:$0x3] }
0x1630   :  { %2397 = vrcp.f32 %v1254_v43  ;;  %v1373_v43 = vrot.slane %v1365_v42, %v2705_v15 }
0x1631   :  { %2399 = vpow2.f32 %v2113_v49 }
0x163a   :  { %v2398_v45 = vpop.eup %2397 }
0x163b   :  { %v1262_v47 = vmul.f32 %v2398_v45, %v2396_v44  ;;  %v2400_v50 = vpop.eup %2399  ;;  %v1261_v5 = vmul.f32 %v2398_v45, %v1179_v4 }
0x163c   :  { %v1255_v51 = vadd.f32 1.0, %v2400_v50 }
0x163d   :  { %1264 = vrot.lane.b32.xlu0 %v1262_v47, %s2562_s3 }
0x163e   :  { %2401 = vrcp.f32 %v1255_v51 }
0x1648   :  { %v2402_v55 = vpop.eup %2401 }
0x16af   :  { %v1265_v52 = vpop.permute.xlu0 %1264 }
0x16b0   :  { %v1267_v54 = vadd.f32 %v1265_v52, %v1261_v5 }
0x16b2   :  { %2403 = vtanh.f32 %v1267_v54 }
0x16bc   :  { %v2404_v7 = vpop.eup %2403 }
0x16bd   :  { %v2933_v57 = vmul.f32 %v2404_v7, %v2402_v55 }
0x16bf   :  { %v1275_v8 = vpack.c.bf16 %v2933_v57, %v2933_v57 }
0x16c1   :  { %1279 = vrot.lane.b32.xlu1 %v1275_v8, %s2562_s3 }
0x1733   :  { %v1280_v9 = vpop.permute.xlu1 %1279 }
0x1734   :  { %2114 = vmatmul.mubr.msk.bf16.vlgmr.msra.gmra.mrb[24].mxu1 %vm234_vm1, %v1280_v9 }
0x1735   :  { %1472 = vmatpush1.bf16.msra.mxu1 %v2908_v20  ;;  %1503 = vmatprep.mubr.bf16.mxu1 %v2561_v1 }
0x1736   :  { %1473 = vmatprep.subr.bf16.mxu1 %v2912_v21 }
0x1739   :  { %1474 = vmatpush1.bf16.msra.mxu1 %v2915_v22 }
0x173a   :  { %1475 = vmatprep.subr.bf16.mxu1 %v2918_v23 }
0x173d   :  { %1476 = vmatpush1.bf16.msra.mxu1 %v2921_v24 }
0x173e   :  { %1477 = vmatprep.subr.bf16.mxu1 %v2924_v25 }
0x1741   :  { %1478 = vmatpush1.bf16.msra.mxu1 %v2927_v27 }
0x1807   :  { %v1329_v11 = vpop.f32.mrb[24].mxu1 }
0x1808   :  { %v1330_v12 = vadd.f32 %v1329_v11, %v1285_v58  ;;  %v1331_v3 = vpop.f32.mrb[25].mxu1 }
0x1809   :  { %v1333_v59 = vpop.f32.mrb[26].mxu1  ;;  %v1332_v2 = vadd.f32 %v1331_v3, %v1289_v63 }
0x180a   :  { %v2115_v60 = vmul.f32 -1.442695, %v1330_v12  ;;  %v1334_v62 = vpop.f32.mrb[27].mxu1  ;;  %v1453_v12 = vld [vmem:[#allocation2 + $0x16] ss:$8 sm:$0x3] }
0x180b   :  { %v2116_v29 = vmul.f32 -1.442695, %v1332_v2  ;;  %v1461_v3 = vrot.slane %v1453_v12, %v2705_v15 }
0x180c   :  { %2405 = vpow2.f32 %v2115_v60 }
0x180d   :  { %2407 = vtanh.f32 %v1332_v2 }
0x1816   :  { %v2406_v4 = vpop.eup %2405 }
0x1817   :  { %v1342_v6 = vadd.f32 1.0, %v2406_v4  ;;  %v2408_v13 = vpop.eup %2407 }
0x1819   :  { %2409 = vrcp.f32 %v1342_v6  ;;  %v1465_v6 = vrot.slane %v1453_v12, %v2710_v17  ;;  %v2563_v12 = vmov 0.0|0.0  }
0x181a   :  { %2411 = vpow2.f32 %v2116_v29 }
0x1823   :  { %v2410_v18 = vpop.eup %2409 }
0x1824   :  { %v1350_v19 = vmul.f32 %v2410_v18, %v2408_v13  ;;  %v2412_v30 = vpop.eup %2411  ;;  %v1349_v33 = vmul.f32 %v2410_v18, %v1267_v54 }
0x1825   :  { %v1343_v31 = vadd.f32 1.0, %v2412_v30 }
0x1826   :  { %1352 = vrot.lane.b32.xlu0 %v1350_v19, %s2562_s3 }
0x1827   :  { %2413 = vrcp.f32 %v1343_v31 }
0x1831   :  { %v2414_v36 = vpop.eup %2413 }
0x1898   :  { %v1353_v34 = vpop.permute.xlu0 %1352 }
0x1899   :  { %v1355_v35 = vadd.f32 %v1353_v34, %v1349_v33 }
0x189b   :  { %2415 = vtanh.f32 %v1355_v35 }
0x18a5   :  { %v2416_v37 = vpop.eup %2415 }
0x18a6   :  { %v2950_v39 = vmul.f32 %v2416_v37, %v2414_v36 }
0x18a8   :  { %v1363_v40 = vpack.c.bf16 %v2950_v39, %v2950_v39 }
0x18aa   :  { %1367 = vrot.lane.b32.xlu1 %v1363_v40, %s2562_s3 }
0x191c   :  { %v1368_v41 = vpop.permute.xlu1 %1367 }
0x191d   :  { %2117 = vmatmul.mubr.msk.bf16.vlgmr.msra.gmra.mrb[28].mxu0 %vm234_vm1, %v1368_v41 }
0x191e   :  { %1560 = vmatpush1.bf16.msra.mxu0 %v2908_v20  ;;  %1591 = vmatprep.mubr.bf16.mxu0 %v2561_v1 }
0x191f   :  { %1561 = vmatprep.subr.bf16.mxu0 %v2912_v21  ;;  %v1377_v21 = vrot.slane %v1365_v42, %v2710_v17 }
0x1922   :  { %1562 = vmatpush1.bf16.msra.mxu0 %v2915_v22 }
0x1923   :  { %1563 = vmatprep.subr.bf16.mxu0 %v2918_v23 }
0x1926   :  { %1564 = vmatpush1.bf16.msra.mxu0 %v2921_v24 }
0x1927   :  { %1565 = vmatprep.subr.bf16.mxu0 %v2924_v25 }
0x192a   :  { %1566 = vmatpush1.bf16.msra.mxu0 %v2927_v27 }
0x19f0   :  { %v1417_v44 = vpop.f32.mrb[28].mxu0 }
0x19f1   :  { %v1418_v45 = vadd.f32 %v1417_v44, %v1373_v43  ;;  %v1419_v20 = vpop.f32.mrb[29].mxu0 }
0x19f2   :  { %v1421_v47 = vpop.f32.mrb[30].mxu0  ;;  %v1420_v22 = vadd.f32 %v1419_v20, %v1377_v21 }
0x19f3   :  { %v2118_v1 = vmul.f32 -1.442695, %v1418_v45  ;;  %v1422_v49 = vpop.f32.mrb[31].mxu0  ;;  %v1541_v47 = vld [vmem:[#allocation2 + $0x17] ss:$8 sm:$0x3] }
0x19f4   :  { %v2119_v51 = vmul.f32 -1.442695, %v1420_v22 }
0x19f5   :  { %2417 = vpow2.f32 %v2118_v1  ;;  %v1549_v1 = vrot.slane %v1541_v47, %v2705_v15  ;;  %v1629_v15 = vld [vmem:[%s3082_s4] sm:$0xff] }
0x19f6   :  { %2419 = vtanh.f32 %v1420_v22 }
0x19ff   :  { %v2418_v23 = vpop.eup %2417 }
0x1a00   :  { %v1430_v50 = vadd.f32 1.0, %v2418_v23  ;;  %v2420_v24 = vpop.eup %2419 }
0x1a02   :  { %2421 = vrcp.f32 %v1430_v50 }
0x1a03   :  { %2423 = vpow2.f32 %v2119_v51 }
0x1a0c   :  { %v2422_v25 = vpop.eup %2421 }
0x1a0d   :  { %v1438_v27 = vmul.f32 %v2422_v25, %v2420_v24  ;;  %v2424_v5 = vpop.eup %2423  ;;  %v1437_v54 = vmul.f32 %v2422_v25, %v1355_v35  ;;  %v1553_v25 = vrot.slane %v1541_v47, %v2710_v17  ;;  %v1630_v17 = vld [vmem:[%s3082_s4 + $0x8] sm:$0xff] }
0x1a0e   :  { %v1431_v52 = vadd.f32 1.0, %v2424_v5 }
0x1a0f   :  { %1440 = vrot.lane.b32.xlu0 %v1438_v27, %s2562_s3 }
0x1a10   :  { %2425 = vrcp.f32 %v1431_v52 }
0x1a1a   :  { %v2426_v8 = vpop.eup %2425 }
0x1a81   :  { %v1441_v55 = vpop.permute.xlu0 %1440 }
0x1a82   :  { %v1443_v7 = vadd.f32 %v1441_v55, %v1437_v54 }
0x1a84   :  { %2427 = vtanh.f32 %v1443_v7 }
0x1a8e   :  { %v2428_v9 = vpop.eup %2427 }
0x1a8f   :  { %v2967_v10 = vmul.f32 %v2428_v9, %v2426_v8 }
0x1a91   :  { %v1451_v58 = vpack.c.bf16 %v2967_v10, %v2967_v10 }
0x1a93   :  { %1455 = vrot.lane.b32.xlu1 %v1451_v58, %s2562_s3 }
0x1b05   :  { %v1456_v11 = vpop.permute.xlu1 %1455 }
0x1b06   :  { %2120 = vmatmul.mubr.msk.bf16.vlgmr.msra.gmra.mrb[28].mxu1 %vm234_vm1, %v1456_v11 }
0x1bd9   :  { %v1505_v59 = vpop.f32.mrb[28].mxu1 }
0x1bda   :  { %v1506_v60 = vadd.f32 %v1505_v59, %v1461_v3  ;;  %v1507_v62 = vpop.f32.mrb[29].mxu1 }
0x1bdb   :  { %v1509_v63 = vpop.f32.mrb[30].mxu1  ;;  %v1508_v13 = vadd.f32 %v1507_v62, %v1465_v6 }
0x1bdc   :  { %v2121_v2 = vmul.f32 -1.442695, %v1506_v60  ;;  %v1510_v4 = vpop.f32.mrb[31].mxu1 }
0x1bdd   :  { %v2122_v33 = vmul.f32 -1.442695, %v1508_v13  ;;  %v1725_v4 = vld [vmem:[#allocation9 + $0x8] sm:$0xff] }
0x1bde   :  { %2429 = vpow2.f32 %v2121_v2  ;;  %v1724_v2 = vld [vmem:[#allocation9] sm:$0xff] }
0x1bdf   :  { %2431 = vtanh.f32 %v1508_v13  ;;  %v2217_v13 = vpack.c.bf16 %v1725_v4, %v1724_v2 }
0x1be1   :  { %2218 = vmatprep.subr.bf16.mxu0 %v2217_v13 }
0x1be8   :  { %v2430_v18 = vpop.eup %2429 }
0x1be9   :  { %v1518_v19 = vadd.f32 1.0, %v2430_v18  ;;  %v2432_v29 = vpop.eup %2431 }
0x1beb   :  { %2433 = vrcp.f32 %v1518_v19 }
0x1bec   :  { %2435 = vpow2.f32 %v2122_v33 }
0x1bf5   :  { %v2434_v30 = vpop.eup %2433 }
0x1bf6   :  { %v1526_v31 = vmul.f32 %v2434_v30, %v2432_v29  ;;  %v2436_v34 = vpop.eup %2435  ;;  %v1525_v36 = vmul.f32 %v2434_v30, %v1443_v7  ;;  %v2209_v7 = vpack.c.bf16 %v1630_v17, %v1629_v15 }
0x1bf7   :  { %v1519_v35 = vadd.f32 1.0, %v2436_v34  ;;  %v1726_v34 = vld [vmem:[#allocation9 + $0x10] sm:$0xff] }
0x1bf8   :  { %1528 = vrot.lane.b32.xlu0 %v1526_v31, %s2562_s3  ;;  %2210 = vmatprep.subr.bf16.mxu1 %v2209_v7 }
0x1bf9   :  { %2437 = vrcp.f32 %v1519_v35  ;;  %2212 = vmatpush3.bf16.msra.mxu1 %v2209_v7  ;;  %v1727_v35 = vld [vmem:[#allocation9 + $0x18] sm:$0xff] }
0x1c03   :  { %v2438_v41 = vpop.eup %2437 }
0x1c6a   :  { %v1529_v37 = vpop.permute.xlu0 %1528 }
0x1c6b   :  { %v2976_v40 = vadd.f32 %v1529_v37, %v1525_v36  ;;  %v2221_v36 = vpack.c.bf16 %v1727_v35, %v1726_v34  ;;  %v2126_v37 = vld [vmem:[%s3083_s5] ss:$0 sm:$0xff] }
0x1c6d   :  { %2439 = vtanh.f32 %v2976_v40 }
0x1c77   :  { %v2440_v42 = vpop.eup %2439 }
0x1c78   :  { %v1533_v43 = vmul.f32 %v2440_v42, %v2438_v41 }
0x1c7a   :  { %v1539_v44 = vpack.c.bf16 %v1533_v43, %v1533_v43 }
0x1c7c   :  { %1543 = vrot.lane.b32.xlu1 %v1539_v44, %s2562_s3 }
0x1c80   :  { %302 = vrot.lane.b32.xlu1 %v2722_v48, %s2562_s3 }
0x1c84   :  { %479 = vrot.lane.b32.xlu1 %v2758_v53, %s2562_s3 }
0x1c88   :  { %655 = vrot.lane.b32.xlu1 %v2794_v56, %s2562_s3 }
0x1c8c   :  { %831 = vrot.lane.b32.xlu1 %v2830_v61, %s2562_s3 }
0x1c90   :  { %1007 = vrot.lane.b32.xlu1 %v2866_v14, %s2562_s3 }
0x1c94   :  { %1183 = vrot.lane.b32.xlu1 %v2902_v16, %s2562_s3 }
0x1c98   :  { %1359 = vrot.lane.b32.xlu1 %v2950_v39, %s2562_s3 }
0x1c9c   :  { %1535 = vrot.lane.b32.xlu1 %v1533_v43, %s2562_s3 }
0x1cee   :  { %v1544_v48 = vpop.permute.xlu1 %1543 }
0x1cef   :  { %2123 = vmatmul.mubr.msk.bf16.vlgmr.msra.gmra.mrb[32].mxu0 %vm234_vm1, %v1544_v48 }
0x1cf0   :  { %2220 = vmatpush3.bf16.msra.mxu0 %v2217_v13 }
0x1cf1   :  { %2222 = vmatprep.subr.bf16.mxu0 %v2221_v36 }
0x1cf2   :  { %v303_v53 = vpop.permute.xlu1 %302 }
0x1cf3   :  { %306 = vst.msk [vmem:[#allocation3] sm:$0x1] %vm305_vm2, %v303_v53 }
0x1cf4   :  { %2224 = vmatpush3.bf16.msra.mxu0 %v2221_v36 }
0x1cf5   :  { %2231 = vmatprep.subr.bf16.mxu0 %v2563_v12 }
0x1cf6   :  { %v480_v56 = vpop.permute.xlu1 %479 }
0x1cf7   :  { %482 = vst.msk [vmem:[#allocation3 + $0x2] sm:$0x1] %vm305_vm2, %v480_v56 }
0x1cfa   :  { %v656_v61 = vpop.permute.xlu1 %655 }
0x1cfb   :  { %658 = vst.msk [vmem:[#allocation3 + $0x4] sm:$0x1] %vm305_vm2, %v656_v61 }
0x1cfe   :  { %v832_v14 = vpop.permute.xlu1 %831 }
0x1cff   :  { %834 = vst.msk [vmem:[#allocation3 + $0x6] sm:$0x1] %vm305_vm2, %v832_v14 }
0x1d02   :  { %v1008_v16 = vpop.permute.xlu1 %1007 }
0x1d03   :  { %1010 = vst.msk [vmem:[#allocation3 + $0x8] sm:$0x1] %vm305_vm2, %v1008_v16  ;;  %v2129_v16 = vld [vmem:[%s3085_s7] ss:$0 sm:$0xff]  ;;  %s2566_s7 = smov [#allocation10]  }
0x1d04   :  { %s2059_s11 = sshll.u32 %s2566_s7, 4  ;;  %s2060_s11 = int_to_ptr.vmem [resolvable:$true] %s2059_s11 }
0x1d05   :  { %s2527_s12 = scalar_lea.vmem %s2060_s11, 16  ;;  %s2531_s13 = scalar_lea.vmem %s2060_s11, 32 }
0x1d06   :  { %v1184_v39 = vpop.permute.xlu1 %1183  ;;  %p2528_p10 = scmp.ne.s32.totalorder %s2060_s11, %s2527_s12  ;;  %p2532_p11 = scmp.lt.s32.totalorder %s2060_s11, %s2060_s11 }
0x1d07   :  { %1186 = vst.msk [vmem:[#allocation3 + $0xa] sm:$0x1] %vm305_vm2, %v1184_v39  ;;  %p2533_p12 = scmp.lt.s32.totalorder %s2531_s13, %s2527_s12 }
0x1d09   :  { %p2534_p13 = por %p2533_p12, %p2532_p11 }
0x1d0a   :  { %v1360_v45 = vpop.permute.xlu1 %1359 }
0x1d0b   :  { %1362 = vst.msk [vmem:[#allocation3 + $0xc] sm:$0x1] %vm305_vm2, %v1360_v45  ;;  %p2535_p0 = pnand %p2534_p13, %p2528_p10 }
0x1d0e   :  { %v1536_v20 = vpop.permute.xlu1 %1535 }
0x1d0f   :  { %1538 = vst.msk [vmem:[#allocation3 + $0xe] sm:$0x1] %vm305_vm2, %v1536_v20 }
0x1dc2   :  { %v1593_v49 = vpop.f32.mrb[32].mxu0 }
0x1dc3   :  { %v1594_v21 = vadd.f32 %v1593_v49, %v1549_v1  ;;  %v1595_v22 = vpop.f32.mrb[33].mxu0 }
0x1dc4   :  { %v1597_v23 = vpop.f32.mrb[34].mxu0  ;;  %v1596_v27 = vadd.f32 %v1595_v22, %v1553_v25 }
0x1dc5   :  { %v2124_v50 = vmul.f32 -1.442695, %v1594_v21  ;;  %v1598_v24 = vpop.f32.mrb[35].mxu0 }
0x1dc7   :  { %2441 = vpow2.f32 %v2124_v50 }
0x1dc8   :  { %2443 = vtanh.f32 %v1596_v27 }
0x1dd1   :  { %v2442_v51 = vpop.eup %2441 }
0x1dd2   :  { %v1606_v5 = vadd.f32 1.0, %v2442_v51  ;;  %v2444_v52 = vpop.eup %2443 }
0x1dd4   :  { %2445 = vrcp.f32 %v1606_v5 }
0x1dde   :  { %v2446_v54 = vpop.eup %2445 }
0x1ddf   :  { %v1614_v55 = vmul.f32 %v2446_v54, %v2444_v52  ;;  %v1613_v8 = vmul.f32 %v2446_v54, %v2976_v40 }
0x1de1   :  { %1616 = vrot.lane.b32.xlu0 %v1614_v55, %s2562_s3 }
0x1de5   :  { %391 = vrot.lane.b32.xlu0 %v2740_v26, %s2562_s3  ;;  %v2125_v26 = vmul.f32 -1.442695, %v1596_v27 }
0x1de7   :  { %2447 = vpow2.f32 %v2125_v26 }
0x1de9   :  { %567 = vrot.lane.b32.xlu0 %v2776_v28, %s2562_s3 }
0x1ded   :  { %743 = vrot.lane.b32.xlu0 %v2812_v32, %s2562_s3 }
0x1df1   :  { %919 = vrot.lane.b32.xlu0 %v2848_v38, %s2562_s3  ;;  %v2448_v28 = vpop.eup %2447 }
0x1df2   :  { %v1607_v32 = vadd.f32 1.0, %v2448_v28 }
0x1df4   :  { %2449 = vrcp.f32 %v1607_v32 }
0x1df5   :  { %1095 = vrot.lane.b32.xlu0 %v2884_v46, %s2562_s3  ;;  %v1631_v46 = vld [vmem:[%s3082_s4 + $0x10] sm:$0xff] }
0x1df9   :  { %1271 = vrot.lane.b32.xlu0 %v2933_v57, %s2562_s3  ;;  %v1632_v57 = vld [vmem:[%s3082_s4 + $0x18] sm:$0xff]  ;;  %s2564_s4 = smov 96  }
0x1dfd   :  { %1447 = vrot.lane.b32.xlu0 %v2967_v10, %s2562_s3  ;;  %v2213_v10 = vpack.c.bf16 %v1632_v57, %v1631_v46 }
0x1dfe   :  { %v2450_v3 = vpop.eup %2449 }
0x1dff   :  { %2214 = vmatprep.subr.bf16.mxu1 %v2213_v10 }
0x1e00   :  { %2216 = vmatpush3.bf16.msra.mxu1 %v2213_v10 }
0x1e01   :  { %2225 = vmatprep.subr.bf16.mxu1 %v2563_v12 }
0x1e53   :  { %v1617_v9 = vpop.permute.xlu0 %1616 }
0x1e54   :  { %v1619_v38 = vadd.f32 %v1617_v9, %v1613_v8 }
0x1e56   :  { %2451 = vtanh.f32 %v1619_v38 }
0x1e57   :  { %v392_v58 = vpop.permute.xlu0 %391 }
0x1e58   :  { %394 = vst.msk [vmem:[#allocation3 + $0x1] sm:$0x1] %vm305_vm2, %v392_v58 }
0x1e5b   :  { %v568_v11 = vpop.permute.xlu0 %567 }
0x1e5c   :  { %570 = vst.msk [vmem:[#allocation3 + $0x3] sm:$0x1] %vm305_vm2, %v568_v11 }
0x1e5f   :  { %v744_v59 = vpop.permute.xlu0 %743 }
0x1e60   :  { %v2452_v60 = vpop.eup %2451  ;;  %746 = vst.msk [vmem:[#allocation3 + $0x5] sm:$0x1] %vm305_vm2, %v744_v59 }
0x1e61   :  { %v1621_v62 = vmul.f32 %v2452_v60, %v2450_v3 }
0x1e63   :  { %v920_v63 = vpop.permute.xlu0 %919  ;;  %1623 = vrot.lane.b32.xlu0 %v1621_v62, %s2562_s3 }
0x1e64   :  { %922 = vst.msk [vmem:[#allocation3 + $0x7] sm:$0x1] %vm305_vm2, %v920_v63 }
0x1e67   :  { %v1096_v6 = vpop.permute.xlu0 %1095 }
0x1e68   :  { %1098 = vst.msk [vmem:[#allocation3 + $0x9] sm:$0x1] %vm305_vm2, %v1096_v6 }
0x1e6b   :  { %v1272_v18 = vpop.permute.xlu0 %1271  ;;  %v1627_v19 = vld [vmem:[#allocation3] sm:$0xff] }
0x1e6c   :  { %1274 = vst.msk [vmem:[#allocation3 + $0xb] sm:$0x1] %vm305_vm2, %v1272_v18  ;;  %1816 = vrot.lane.b32.xlu1 %v1627_v19, %s2564_s4  ;;  %2168 = vmatprep.mubr.msk.f32.mxu1 %vm1640_vm3, %v1627_v19 }
0x1e6f   :  { %v1448_v29 = vpop.permute.xlu0 %1447 }
0x1e70   :  { %1450 = vst.msk [vmem:[#allocation3 + $0xd] sm:$0x1] %vm305_vm2, %v1448_v29 }
0x1ed5   :  { %v1624_v30 = vpop.permute.xlu0 %1623 }
0x1ed6   :  { %1626 = vst.msk [vmem:[#allocation3 + $0xf] sm:$0x1] %vm305_vm2, %v1624_v30 }
0x1edd   :  { %v1628_v31 = vld [vmem:[#allocation3 + $0x8] sm:$0xff] }
0x1ede   :  { %2169 = vmatmul.mubr.msk.f32.vlgmr.msra.gmra.mrb[32].mxu1 %vm1640_vm3, %v1628_v31  ;;  %v1817_v33 = vpop.permute.xlu1 %1816 }
0x1edf   :  { %2227 = vmatpush3.bf16.msra.mxu1 %v2209_v7  ;;  %2190 = vmatprep.mubr.msk.f32.mxu1 %vm2565_vm4, %v2560_v0 }
0x1ee0   :  { %2228 = vmatprep.subr.bf16.mxu1 %v2563_v12 }
0x1ee3   :  { %2230 = vmatpush3.bf16.msra.mxu1 %v2213_v10 }
0x1ee4   :  { %2204 = vmatprep.subr.mxu1 %v2560_v0 }
0x1ee6   :  { %2191 = vmatmul.mubr.msk.f32.vlgmr.msra.gmra.mrb[34].mxu1 %vm1640_vm3, %v1817_v33 }
0x1ee7   :  { %2206 = vmatprep.mubr.msk.f32.mxu1 %vm2565_vm4, %v2560_v0 }
0x1fb1   :  { %v2170_v40 = vpop.f32.mrb[32].mxu1 }
0x1fb2   :  { %v1719_v41 = vadd.f32 %v2170_v40, %v2126_v37  ;;  %v1713_v42 = vpop.f32.mrb[33].mxu1 }
0x1fb3   :  { %v1714_v43 = vadd.f32 %v2126_v37, %v1713_v42 }
0x1fb4   :  { %v1723_v48 = vmax.f32 %v1719_v41, 0.0 }
0x1fb5   :  { %v1722_v44 = vmax.f32 %v1714_v43, 0.0 }
0x1fb7   :  { %2179 = vmatprep.mubr.msk.f32.mxu0 %vm1640_vm3, %v1722_v44 }
0x1fb8   :  { %2180 = vmatmul.mubr.msk.f32.vlgmr.msra.gmra.mrb[36].mxu0 %vm1640_vm3, %v1723_v48 }
0x1fb9   :  { %v1886_v53 = vpop.f32.mrb[34].mxu1  ;;  %2233 = vmatpush3.bf16.msra.mxu0 %v2217_v13  ;;  %2201 = vmatprep.mubr.msk.f32.mxu0 %vm2565_vm4, %v2560_v0 }
0x1fba   :  { %v1887_v56 = vadd.f32 %v2126_v37, %v1886_v53  ;;  %v2192_v61 = vpop.f32.mrb[35].mxu1  ;;  %2234 = vmatprep.subr.bf16.mxu0 %v2563_v12 }
0x1fbc   :  { %v1890_v14 = vmax.f32 %v1887_v56, 0.0 }
0x1fbd   :  { %2236 = vmatpush3.bf16.msra.mxu0 %v2221_v36 }
0x1fc0   :  { %2202 = vmatmul.mubr.msk.f32.vlgmr.msra.gmra.mrb[38].mxu0 %vm1640_vm3, %v1890_v14 }
0x208b   :  { %v2181_v39 = vpop.f32.mrb[36].mxu0 }
0x208c   :  { %v1813_v45 = vadd.f32 %v2181_v39, %v2129_v16  ;;  %v1807_v20 = vpop.f32.mrb[37].mxu0 }
0x208d   :  { %v1808_v47 = vadd.f32 %v2129_v16, %v1807_v20 }
0x208e   :  { %v1965_v1 = vsel %vm1640_vm3, %v1813_v45, 0.0 }
0x208f   :  { %v1964_v49 = vsel %vm1640_vm3, %v1808_v47, 0.0 }
0x2090   :  { %v1966_v0 = vadd.f32 %v1965_v1, %v1964_v49 }
0x2092   :  { %v1967_v21 = vrot.slane %v1966_v0, 4 }
0x2093   :  { %v1960_v22 = vpop.f32.mrb[38].mxu0 }
0x2094   :  { %v1968_v23 = vadd.f32 %v1967_v21, %v1966_v0  ;;  %v1961_v50 = vadd.f32 %v2129_v16, %v1960_v22  ;;  %v2203_v24 = vpop.f32.mrb[39].mxu0 }
0x2096   :  { %v1969_v25 = vrot.slane %v1968_v23, 2  ;;  %2205 = vmatpush3.xpose.msk.msra.mxu1 %vm1640_vm3, %v1961_v50 }
0x2098   :  { %v1970_v27 = vadd.f32 %v1969_v25, %v1968_v23 }
0x209a   :  { %v1971_v51 = vrot.slane %v1970_v27, 1 }
0x209c   :  { %v1972_v5 = vadd.f32 %v1971_v51, %v1970_v27 }
0x209e   :  { %v1974_v52 = vmul.f32 0.0625, %v1972_v5 }
0x20a0   :  { %2207 = vmatmul.mubr.msk.f32.vlgmr.msra.gmra.mrb[36].mxu1 %vm1640_vm3, %v1974_v52 }
0x2173   :  { %v2047_v54 = vpop.f32.mrb[36].mxu1 }
0x2174   :  { %v2208_v55 = vpop.f32.mrb[37].mxu1  ;;  %2052 = vst.msk [vmem:[#allocation10] sm:$0x1] %vm2051_vm5, %v2047_v54 }
0x2175   :  { %2538 = shalt.err (!%p2535_p0)
}
0x2176   :  { %s2539_s18 = scalar_lea.hbm %s3086_s8, 16 }
0x2177   :  { %p2540_p1 = scmp.ne.s32.totalorder %s3086_s8, %s2539_s18  ;;  %p2543_p2 = scmp.lt.u32.totalorder %s2539_s18, %s3086_s8 }
0x2179   :  { %p2545_p3 = pnand %p2543_p2, %p2540_p1 }
0x217b   :  { %2548 = shalt.err (!%p2545_p3)
}
0x217c   :  { %2062 = dma.vmem_to_hbm [thread:$0]  %s2060_s11, 16, %s3086_s8, [#allocation6]  }
0x217d   :  { %2553 = dma.done.wait [#allocation6], 16  }
0x217e   :  { %2554 = vsyncadd [#allocation6], 4294967280 }
0x217f   :  { %2066 = vsyncpa [#allocation5], 1 }
0x2180   :  { %2067 = vsyncpa [#allocation8], 1 }
0x2181   :  { %2068 = vsyncpa [#allocation6], 1 }

</bundles_post_ra>
